<compile_context>
chip_gen: v7x
topology: tpu7x:2x2x1
jax: 0.10.0
libtpu: 0.0.40
codegen_flags: <defaults>
</compile_context>

<pallas_src>
import functools

import jax
import jax.numpy as jnp
from jax import lax
from jax.experimental import pallas as pl
from jax.experimental.pallas import tpu as pltpu

EPS = 1e-5      # nn.LayerNorm default eps
NEG_BIG = -1e30  # additive causal mask value (exp underflows to exactly 0.0)


# ----------------------------- kernel helpers ------------------------------
def _layer_norm(x, gamma, beta):
    mu = jnp.mean(x, axis=-1, keepdims=True)
    var = jnp.mean((x - mu) ** 2, axis=-1, keepdims=True)
    return (x - mu) * lax.rsqrt(var + EPS) * gamma + beta


# ------------------------- fused GPT forward kernel --------------------------
def gpt_kernel(x_ref,
               ln1g_ref, ln1b_ref, wqkv_ref, wo_ref, bo_ref,
               ln2g_ref, ln2b_ref, w1_ref, b1_ref, w2_ref, b2_ref,
               lnfg_ref, lnfb_ref, wlm_ref, blm_ref,
               out_ref, *, head_count, layer_count):
    x = x_ref[0]                                     # (T, E) f32 activations
    T, E = x.shape
    hs = E // head_count

    # additive causal mask built in-kernel (two iota compares, no HBM traffic)
    row = lax.broadcasted_iota(jnp.int32, (T, T), 0)
    col = lax.broadcasted_iota(jnp.int32, (T, T), 1)
    mask = jnp.where(col <= row, 0.0, NEG_BIG).astype(jnp.float32)

    # all L layers run here; stacked weights are fully VMEM-resident
    for l in range(layer_count):                     # static loop, L is small
        # --- multi-head causal self-attention on LayerNorm(x) ---
        xn = _layer_norm(x, ln1g_ref[l], ln1b_ref[l])
        # fused QKV projection: bf16 MXU operands, f32 accumulation.
        # hs**-0.5 scale is already folded into the Q columns of wqkv.
        qkv = jnp.dot(xn.astype(jnp.bfloat16), wqkv_ref[l],
                      preferred_element_type=jnp.float32)       # (T, 3E)
        wo = wo_ref[l]                               # (E, E) bf16

        attn = jnp.zeros((T, E), jnp.float32)
        # NOTE: 16-lane head slices are sub-vreg extracts; acceptable at
        # (T, hs) = (8, 16) — restructure onto sublanes if heads scale up.
        for h in range(head_count):                  # static loop, H is small
            q = qkv[:, h * hs:(h + 1) * hs].astype(jnp.bfloat16)
            k = qkv[:, E + h * hs:E + (h + 1) * hs].astype(jnp.bfloat16)
            v = qkv[:, 2 * E + h * hs:2 * E + (h + 1) * hs].astype(jnp.bfloat16)
            # q @ k^T without materializing a transpose (contract last dims)
            s = lax.dot_general(q, k, (((1,), (1,)), ((), ())),
                                preferred_element_type=jnp.float32) + mask
            s = s - jnp.max(s, axis=-1, keepdims=True)
            p = jnp.exp(s)
            inv = pl.reciprocal(jnp.sum(p, axis=-1, keepdims=True), approx=True)
            # defer the softmax normalization past the p@v matmul (EUP recip)
            head = jnp.dot(p.astype(jnp.bfloat16), v,
                           preferred_element_type=jnp.float32) * inv   # (T, hs)
            # fold the output projection per head -> no concatenate relayout
            attn = attn + jnp.dot(head.astype(jnp.bfloat16),
                                  wo[h * hs:(h + 1) * hs, :],
                                  preferred_element_type=jnp.float32)
        x = x + attn + bo_ref[l]                     # residual (dropout = id)

        # --- feed-forward on LayerNorm(x) ---
        xn2 = _layer_norm(x, ln2g_ref[l], ln2b_ref[l])
        h1 = jnp.maximum(
            jnp.dot(xn2.astype(jnp.bfloat16), w1_ref[l],
                    preferred_element_type=jnp.float32) + b1_ref[l], 0.0)
        x = x + jnp.dot(h1.astype(jnp.bfloat16), w2_ref[l],
                        preferred_element_type=jnp.float32) + b2_ref[l]

    # --- final LayerNorm + LM head (lane-dense padded vocab) ---
    xf = _layer_norm(x, lnfg_ref[...], lnfb_ref[...])
    out_ref[0] = jnp.dot(xf.astype(jnp.bfloat16), wlm_ref[...],
                         preferred_element_type=jnp.float32) + blm_ref[...]


# ------------------------------- wrapper -----------------------------------
def gpt_forward(params, tokens):
    """GptOne.forward with solution_tokens=None -> returns logits (B, T, V)."""
    B, T = tokens.shape
    E = params["tok_emb"].shape[1]
    H = params["head_count"]
    V = params["vocab_size"]
    L = params["wqkv"].shape[0]
    Vpad = params["w_lm_pad"].shape[1]

    tok_emb = params["tok_emb"][tokens]              # (B, T, E) gather (glue)
    pos_emb = params["pos_emb"][:T]                  # (T, E)
    x = (tok_emb + pos_emb).astype(jnp.float32)

    weight_names = ("ln1_g", "ln1_b", "wqkv", "wo", "bo",
                    "ln2_g", "ln2_b", "w1", "b1", "w2", "b2",
                    "ln_f_g", "ln_f_b", "w_lm_pad", "b_lm_pad")
    weights = [params[n] for n in weight_names]

    def resident_spec(a):
        # full array as one block, constant index -> fetched once, VMEM-resident
        nd = a.ndim
        return pl.BlockSpec(a.shape, lambda b, _nd=nd: (0,) * _nd)

    in_specs = ([pl.BlockSpec((1, T, E), lambda b: (b, 0, 0))]
                + [resident_spec(a) for a in weights])

    logits_pad = pl.pallas_call(
        functools.partial(gpt_kernel, head_count=H, layer_count=L),
        out_shape=jax.ShapeDtypeStruct((B, T, Vpad), jnp.float32),
        grid=(B,),                                   # parallel batch axis (>=2
        in_specs=in_specs,                           # so both v7x TCs work)
        out_specs=pl.BlockSpec((1, T, Vpad), lambda b: (b, 0, 0)),
        compiler_params=pltpu.CompilerParams(
            dimension_semantics=("parallel",)),
    )(x, *weights)

    # drop the zero-padded vocab lanes
    return logits_pad[..., :V]
    # TODO(synk): cross-entropy loss branch (solution_tokens != None) and the
    # autoregressive `generate` multinomial-sampling loop are host-side control
    # flow, not kernelized.


# --------------------------- parameter creation ------------------------------
def init_params(key, vocab_size, embed_dim, head_count, layer_count,
                context_length):
    E, L, H = embed_dim, layer_count, head_count
    hs = E // H
    v_pad = max(128, ((vocab_size + 127) // 128) * 128)
    ks = list(jax.random.split(key, 16))

    def nrm(k, shape, scale=0.02):
        return (scale * jax.random.normal(k, shape)).astype(jnp.float32)

    w_lm = nrm(ks[0], (E, vocab_size))
    b_lm = nrm(ks[1], (1, vocab_size))
    w_lm_pad = jnp.zeros((E, v_pad), jnp.float32).at[:, :vocab_size].set(w_lm)
    b_lm_pad = jnp.zeros((1, v_pad), jnp.float32).at[:, :vocab_size].set(b_lm)

    # fused QKV weight [Q_heads | K_heads | V_heads]; the hs**-0.5 attention
    # scale is pre-folded into the Q columns (one-time weight transform, the
    # kernel and the reference both use the folded weight with no runtime scale)
    wqkv = nrm(ks[8], (L, E, 3 * E))
    wqkv = wqkv.at[:, :, :E].multiply(float(hs) ** -0.5)

    params = {
        "head_count": head_count,
        "vocab_size": vocab_size,
        "tok_emb": nrm(ks[2], (vocab_size, E), 1.0),
        "pos_emb": nrm(ks[3], (context_length, E), 1.0),
        "ln_f_g": (1.0 + nrm(ks[4], (1, E))),
        "ln_f_b": nrm(ks[5], (1, E)),
        "w_lm_pad": w_lm_pad.astype(jnp.bfloat16),   # matmul weight -> bf16
        "b_lm_pad": b_lm_pad,
        # stacked per-layer weights (leading L axis); matmul weights in bf16,
        # LayerNorm params / biases in f32
        "ln1_g": (1.0 + nrm(ks[6], (L, 1, E))),
        "ln1_b": nrm(ks[7], (L, 1, E)),
        "wqkv": wqkv.astype(jnp.bfloat16),
        "wo": nrm(ks[9], (L, E, E)).astype(jnp.bfloat16),
        "bo": nrm(ks[10], (L, 1, E)),
        "ln2_g": (1.0 + nrm(ks[11], (L, 1, E))),
        "ln2_b": nrm(ks[12], (L, 1, E)),
        "w1": nrm(ks[13], (L, E, 4 * E)).astype(jnp.bfloat16),
        "b1": nrm(ks[14], (L, 1, 4 * E)),
        "w2": nrm(ks[15], (L, 4 * E, E)).astype(jnp.bfloat16),
        "b2": jnp.zeros((L, 1, E), jnp.float32),
    }
    return params


# ------------------------------ pure-JAX ref ---------------------------------
def _ref_ln(x, g, b):
    mu = jnp.mean(x, axis=-1, keepdims=True)
    var = jnp.mean((x - mu) ** 2, axis=-1, keepdims=True)
    return (x - mu) / jnp.sqrt(var + EPS) * g + b


def ref_forward(params, tokens):
    B, T = tokens.shape
    E = params["tok_emb"].shape[1]
    H = params["head_count"]
    hs = E // H
    V = params["vocab_size"]
    L = params["wqkv"].shape[0]
    x = params["tok_emb"][tokens] + params["pos_emb"][:T]
    tril = jnp.tril(jnp.ones((T, T), bool))
    for l in range(L):
        xn = _ref_ln(x, params["ln1_g"][l], params["ln1_b"][l])
        qkv = xn @ params["wqkv"][l].astype(jnp.float32)          # (B, T, 3E)
        outs = []
        for h in range(H):
            q = qkv[..., h * hs:(h + 1) * hs]
            k = qkv[..., E + h * hs:E + (h + 1) * hs]
            v = qkv[..., 2 * E + h * hs:2 * E + (h + 1) * hs]
            # hs**-0.5 scale already folded into the Q columns of wqkv
            s = jnp.einsum("btd,bsd->bts", q, k)
            s = jnp.where(tril, s, -jnp.inf)
            p = jax.nn.softmax(s, axis=-1)
            outs.append(jnp.einsum("bts,bsd->btd", p, v))
        attn = jnp.concatenate(outs, -1)
        x = x + attn @ params["wo"][l].astype(jnp.float32) + params["bo"][l]
        xn2 = _ref_ln(x, params["ln2_g"][l], params["ln2_b"][l])
        h1 = jax.nn.relu(xn2 @ params["w1"][l].astype(jnp.float32)
                         + params["b1"][l])
        x = x + h1 @ params["w2"][l].astype(jnp.float32) + params["b2"][l]
    xn = _ref_ln(x, params["ln_f_g"], params["ln_f_b"])
    logits = xn @ params["w_lm_pad"].astype(jnp.float32) + params["b_lm_pad"]
    return logits[..., :V]


# ---------------------------------- main -------------------------------------
if __name__ == "__main__":
    # Small, self-consistent hyperparameters for the synthetic run.
    VOCAB_SIZE = 48
    EMBED_DIM = 64
    HEAD_COUNT = 4       # head_size = 16
    LAYER_COUNT = 2
    CONTEXT_LEN = 16
    BATCH = 2
    SEQ = 8              # token_count <= context_length

    key = jax.random.PRNGKey(0)
    k_params, k_tok = jax.random.split(key)
    params = init_params(k_params, VOCAB_SIZE, EMBED_DIM, HEAD_COUNT,
                         LAYER_COUNT, CONTEXT_LEN)
    tokens = jax.random.randint(k_tok, (BATCH, SEQ), 0, VOCAB_SIZE,
                                dtype=jnp.int32)

    logits = jax.block_until_ready(gpt_forward(params, tokens))
    ref = jax.block_until_ready(ref_forward(params, tokens))

    assert logits.shape == (BATCH, SEQ, VOCAB_SIZE)
    assert bool(jnp.all(jnp.isfinite(logits))), "non-finite logits"
    # bf16 matmul operands + approx reciprocal vs. the f32 reference -> use a
    # correspondingly looser tolerance than the previous all-f32 version.
    assert jnp.allclose(logits, ref, atol=1.5e-2, rtol=1.5e-2), \
        "mismatch vs reference"
    print("KERNEL_OK")
</pallas_src>

<mosaic_0001>
module attributes {stable_mosaic.version = 11 : i64} {
  func.func @gpt_kernel(%arg0: i32, %arg1: memref<1x8x64xf32, #tpu.memory_space<vmem>>, %arg2: memref<2x1x64xf32, #tpu.memory_space<vmem>>, %arg3: memref<2x1x64xf32, #tpu.memory_space<vmem>>, %arg4: memref<2x64x192xbf16, #tpu.memory_space<vmem>>, %arg5: memref<2x64x64xbf16, #tpu.memory_space<vmem>>, %arg6: memref<2x1x64xf32, #tpu.memory_space<vmem>>, %arg7: memref<2x1x64xf32, #tpu.memory_space<vmem>>, %arg8: memref<2x1x64xf32, #tpu.memory_space<vmem>>, %arg9: memref<2x64x256xbf16, #tpu.memory_space<vmem>>, %arg10: memref<2x1x256xf32, #tpu.memory_space<vmem>>, %arg11: memref<2x256x64xbf16, #tpu.memory_space<vmem>>, %arg12: memref<2x1x64xf32, #tpu.memory_space<vmem>>, %arg13: memref<1x64xf32, #tpu.memory_space<vmem>>, %arg14: memref<1x64xf32, #tpu.memory_space<vmem>>, %arg15: memref<64x128xbf16, #tpu.memory_space<vmem>>, %arg16: memref<1x128xf32, #tpu.memory_space<vmem>>, %arg17: memref<1x8x128xf32, #tpu.memory_space<vmem>>) attributes {dimension_semantics = [#tpu.dimension_semantics<parallel>], iteration_bounds = array<i64: 2>, scalar_prefetch = 0 : i64, scratch_operands = 0 : i64, tpu.core_type = #tpu.core_type<tc>, window_params = [{transform_indices = @transform_0, window_bounds = array<i64: 1, 8, 64>}, {pipeline_mode = #tpu.pipeline_mode<synchronous>, transform_indices = @transform_1, window_bounds = array<i64: 2, 1, 64>}, {pipeline_mode = #tpu.pipeline_mode<synchronous>, transform_indices = @transform_2, window_bounds = array<i64: 2, 1, 64>}, {pipeline_mode = #tpu.pipeline_mode<synchronous>, transform_indices = @transform_3, window_bounds = array<i64: 2, 64, 192>}, {pipeline_mode = #tpu.pipeline_mode<synchronous>, transform_indices = @transform_4, window_bounds = array<i64: 2, 64, 64>}, {pipeline_mode = #tpu.pipeline_mode<synchronous>, transform_indices = @transform_5, window_bounds = array<i64: 2, 1, 64>}, {pipeline_mode = #tpu.pipeline_mode<synchronous>, transform_indices = @transform_6, window_bounds = array<i64: 2, 1, 64>}, {pipeline_mode = #tpu.pipeline_mode<synchronous>, transform_indices = @transform_7, window_bounds = array<i64: 2, 1, 64>}, {pipeline_mode = #tpu.pipeline_mode<synchronous>, transform_indices = @transform_8, window_bounds = array<i64: 2, 64, 256>}, {pipeline_mode = #tpu.pipeline_mode<synchronous>, transform_indices = @transform_9, window_bounds = array<i64: 2, 1, 256>}, {pipeline_mode = #tpu.pipeline_mode<synchronous>, transform_indices = @transform_10, window_bounds = array<i64: 2, 256, 64>}, {pipeline_mode = #tpu.pipeline_mode<synchronous>, transform_indices = @transform_11, window_bounds = array<i64: 2, 1, 64>}, {pipeline_mode = #tpu.pipeline_mode<synchronous>, transform_indices = @transform_12, window_bounds = array<i64: 1, 64>}, {pipeline_mode = #tpu.pipeline_mode<synchronous>, transform_indices = @transform_13, window_bounds = array<i64: 1, 64>}, {pipeline_mode = #tpu.pipeline_mode<synchronous>, transform_indices = @transform_14, window_bounds = array<i64: 64, 128>}, {pipeline_mode = #tpu.pipeline_mode<synchronous>, transform_indices = @transform_15, window_bounds = array<i64: 1, 128>}, {transform_indices = @transform_16, window_bounds = array<i64: 1, 8, 128>}]} {
    %c0 = arith.constant 0 : index
    %c0_0 = arith.constant 0 : index
    %c0_1 = arith.constant 0 : index
    %0 = vector.load %arg1[%c0, %c0_0, %c0_1] : memref<1x8x64xf32, #tpu.memory_space<vmem>>, vector<1x8x64xf32>
    %1 = vector.shape_cast %0 : vector<1x8x64xf32> to vector<8x64xf32>
    %2 = tpu.iota {dimensions = array<i32: 0>} : vector<8x8xi32>
    %3 = tpu.iota {dimensions = array<i32: 1>} : vector<8x8xi32>
    %4 = arith.cmpi sle, %3, %2 : vector<8x8xi32>
    %cst = arith.constant 0.000000e+00 : f32
    %cst_2 = arith.constant -1.000000e+30 : f32
    %5 = vector.broadcast %cst : f32 to vector<8x8xf32>
    %6 = vector.broadcast %cst_2 : f32 to vector<8x8xf32>
    %7 = arith.select %4, %5, %6 : vector<8x8xi1>, vector<8x8xf32>
    %c0_3 = arith.constant 0 : index
    %c0_4 = arith.constant 0 : index
    %c0_5 = arith.constant 0 : index
    %8 = vector.load %arg2[%c0_3, %c0_4, %c0_5] : memref<2x1x64xf32, #tpu.memory_space<vmem>>, vector<1x1x64xf32>
    %9 = vector.shape_cast %8 : vector<1x1x64xf32> to vector<1x64xf32>
    %c0_6 = arith.constant 0 : index
    %c0_7 = arith.constant 0 : index
    %c0_8 = arith.constant 0 : index
    %10 = vector.load %arg3[%c0_6, %c0_7, %c0_8] : memref<2x1x64xf32, #tpu.memory_space<vmem>>, vector<1x1x64xf32>
    %11 = vector.shape_cast %10 : vector<1x1x64xf32> to vector<1x64xf32>
    %cst_9 = arith.constant dense<0.000000e+00> : vector<8xf32>
    %12 = vector.multi_reduction <add>, %1, %cst_9 [1] : vector<8x64xf32> to vector<8xf32>
    %13 = vector.shape_cast %12 : vector<8xf32> to vector<8x1xf32>
    %cst_10 = arith.constant 6.400000e+01 : f32
    %14 = vector.broadcast %cst_10 : f32 to vector<8x1xf32>
    %15 = arith.divf %13, %14 : vector<8x1xf32>
    %16 = vector.broadcast %15 : vector<8x1xf32> to vector<8x64xf32>
    %17 = arith.subf %1, %16 : vector<8x64xf32>
    %18 = arith.mulf %17, %17 : vector<8x64xf32>
    %cst_11 = arith.constant dense<0.000000e+00> : vector<8xf32>
    %19 = vector.multi_reduction <add>, %18, %cst_11 [1] : vector<8x64xf32> to vector<8xf32>
    %20 = vector.shape_cast %19 : vector<8xf32> to vector<8x1xf32>
    %cst_12 = arith.constant 6.400000e+01 : f32
    %21 = vector.broadcast %cst_12 : f32 to vector<8x1xf32>
    %22 = arith.divf %20, %21 : vector<8x1xf32>
    %23 = vector.broadcast %15 : vector<8x1xf32> to vector<8x64xf32>
    %24 = arith.subf %1, %23 : vector<8x64xf32>
    %cst_13 = arith.constant 9.99999974E-6 : f32
    %25 = vector.broadcast %cst_13 : f32 to vector<8x1xf32>
    %26 = arith.addf %22, %25 : vector<8x1xf32>
    %27 = math.rsqrt %26 : vector<8x1xf32>
    %28 = vector.broadcast %27 : vector<8x1xf32> to vector<8x64xf32>
    %29 = arith.mulf %24, %28 : vector<8x64xf32>
    %30 = vector.broadcast %9 : vector<1x64xf32> to vector<8x64xf32>
    %31 = arith.mulf %29, %30 : vector<8x64xf32>
    %32 = vector.broadcast %11 : vector<1x64xf32> to vector<8x64xf32>
    %33 = arith.addf %31, %32 : vector<8x64xf32>
    %34 = arith.truncf %33 : vector<8x64xf32> to vector<8x64xbf16>
    %c0_14 = arith.constant 0 : index
    %c0_15 = arith.constant 0 : index
    %c0_16 = arith.constant 0 : index
    %35 = vector.load %arg4[%c0_14, %c0_15, %c0_16] : memref<2x64x192xbf16, #tpu.memory_space<vmem>>, vector<1x64x192xbf16>
    %36 = vector.shape_cast %35 : vector<1x64x192xbf16> to vector<64x192xbf16>
    %cst_17 = arith.constant dense<0.000000e+00> : vector<8x192xf32>
    %37 = tpu.matmul %34, %36, %cst_17 {dimension_numbers = #tpu.dot_dimension_numbers<[1], [0], [0], [1], [0, 0, 1, 1], [], []>} : vector<8x64xbf16>, vector<64x192xbf16>, vector<8x192xf32> -> vector<8x192xf32>
    %c0_18 = arith.constant 0 : index
    %c0_19 = arith.constant 0 : index
    %c0_20 = arith.constant 0 : index
    %38 = vector.load %arg5[%c0_18, %c0_19, %c0_20] : memref<2x64x64xbf16, #tpu.memory_space<vmem>>, vector<1x64x64xbf16>
    %39 = vector.shape_cast %38 : vector<1x64x64xbf16> to vector<64x64xbf16>
    %cst_21 = arith.constant 0.000000e+00 : f32
    %40 = vector.broadcast %cst_21 : f32 to vector<8x64xf32>
    %41 = vector.extract_strided_slice %37 {offsets = [0, 0], sizes = [8, 16], strides = [1, 1]} : vector<8x192xf32> to vector<8x16xf32>
    %42 = arith.truncf %41 : vector<8x16xf32> to vector<8x16xbf16>
    %43 = vector.extract_strided_slice %37 {offsets = [0, 64], sizes = [8, 16], strides = [1, 1]} : vector<8x192xf32> to vector<8x16xf32>
    %44 = arith.truncf %43 : vector<8x16xf32> to vector<8x16xbf16>
    %45 = vector.extract_strided_slice %37 {offsets = [0, 128], sizes = [8, 16], strides = [1, 1]} : vector<8x192xf32> to vector<8x16xf32>
    %46 = arith.truncf %45 : vector<8x16xf32> to vector<8x16xbf16>
    %cst_22 = arith.constant dense<0.000000e+00> : vector<8x8xf32>
    %47 = tpu.matmul %42, %44, %cst_22 {dimension_numbers = #tpu.dot_dimension_numbers<[1], [1], [0], [0], [0, 0, 1, 0], [], []>} : vector<8x16xbf16>, vector<8x16xbf16>, vector<8x8xf32> -> vector<8x8xf32>
    %48 = arith.addf %47, %7 : vector<8x8xf32>
    %cst_23 = arith.constant dense<0xFF800000> : vector<8xf32>
    %49 = vector.multi_reduction <maximumf>, %48, %cst_23 [1] : vector<8x8xf32> to vector<8xf32>
    %50 = vector.shape_cast %49 : vector<8xf32> to vector<8x1xf32>
    %51 = vector.broadcast %50 : vector<8x1xf32> to vector<8x8xf32>
    %52 = arith.subf %48, %51 : vector<8x8xf32>
    %53 = math.exp %52 : vector<8x8xf32>
    %cst_24 = arith.constant dense<0.000000e+00> : vector<8xf32>
    %54 = vector.multi_reduction <add>, %53, %cst_24 [1] : vector<8x8xf32> to vector<8xf32>
    %55 = vector.shape_cast %54 : vector<8xf32> to vector<8x1xf32>
    %56 = tpu.reciprocal %55 {approx = true} : vector<8x1xf32> -> vector<8x1xf32>
    %57 = arith.truncf %53 : vector<8x8xf32> to vector<8x8xbf16>
    %cst_25 = arith.constant dense<0.000000e+00> : vector<8x16xf32>
    %58 = tpu.matmul %57, %46, %cst_25 {dimension_numbers = #tpu.dot_dimension_numbers<[1], [0], [0], [1], [0, 0, 1, 1], [], []>} : vector<8x8xbf16>, vector<8x16xbf16>, vector<8x16xf32> -> vector<8x16xf32>
    %59 = vector.broadcast %56 : vector<8x1xf32> to vector<8x16xf32>
    %60 = arith.mulf %58, %59 : vector<8x16xf32>
    %61 = arith.truncf %60 : vector<8x16xf32> to vector<8x16xbf16>
    %62 = vector.extract_strided_slice %39 {offsets = [0, 0], sizes = [16, 64], strides = [1, 1]} : vector<64x64xbf16> to vector<16x64xbf16>
    %cst_26 = arith.constant dense<0.000000e+00> : vector<8x64xf32>
    %63 = tpu.matmul %61, %62, %cst_26 {dimension_numbers = #tpu.dot_dimension_numbers<[1], [0], [0], [1], [0, 0, 1, 1], [], []>} : vector<8x16xbf16>, vector<16x64xbf16>, vector<8x64xf32> -> vector<8x64xf32>
    %64 = arith.addf %40, %63 : vector<8x64xf32>
    %65 = vector.extract_strided_slice %37 {offsets = [0, 16], sizes = [8, 16], strides = [1, 1]} : vector<8x192xf32> to vector<8x16xf32>
    %66 = arith.truncf %65 : vector<8x16xf32> to vector<8x16xbf16>
    %67 = vector.extract_strided_slice %37 {offsets = [0, 80], sizes = [8, 16], strides = [1, 1]} : vector<8x192xf32> to vector<8x16xf32>
    %68 = arith.truncf %67 : vector<8x16xf32> to vector<8x16xbf16>
    %69 = vector.extract_strided_slice %37 {offsets = [0, 144], sizes = [8, 16], strides = [1, 1]} : vector<8x192xf32> to vector<8x16xf32>
    %70 = arith.truncf %69 : vector<8x16xf32> to vector<8x16xbf16>
    %cst_27 = arith.constant dense<0.000000e+00> : vector<8x8xf32>
    %71 = tpu.matmul %66, %68, %cst_27 {dimension_numbers = #tpu.dot_dimension_numbers<[1], [1], [0], [0], [0, 0, 1, 0], [], []>} : vector<8x16xbf16>, vector<8x16xbf16>, vector<8x8xf32> -> vector<8x8xf32>
    %72 = arith.addf %71, %7 : vector<8x8xf32>
    %cst_28 = arith.constant dense<0xFF800000> : vector<8xf32>
    %73 = vector.multi_reduction <maximumf>, %72, %cst_28 [1] : vector<8x8xf32> to vector<8xf32>
    %74 = vector.shape_cast %73 : vector<8xf32> to vector<8x1xf32>
    %75 = vector.broadcast %74 : vector<8x1xf32> to vector<8x8xf32>
    %76 = arith.subf %72, %75 : vector<8x8xf32>
    %77 = math.exp %76 : vector<8x8xf32>
    %cst_29 = arith.constant dense<0.000000e+00> : vector<8xf32>
    %78 = vector.multi_reduction <add>, %77, %cst_29 [1] : vector<8x8xf32> to vector<8xf32>
    %79 = vector.shape_cast %78 : vector<8xf32> to vector<8x1xf32>
    %80 = tpu.reciprocal %79 {approx = true} : vector<8x1xf32> -> vector<8x1xf32>
    %81 = arith.truncf %77 : vector<8x8xf32> to vector<8x8xbf16>
    %cst_30 = arith.constant dense<0.000000e+00> : vector<8x16xf32>
    %82 = tpu.matmul %81, %70, %cst_30 {dimension_numbers = #tpu.dot_dimension_numbers<[1], [0], [0], [1], [0, 0, 1, 1], [], []>} : vector<8x8xbf16>, vector<8x16xbf16>, vector<8x16xf32> -> vector<8x16xf32>
    %83 = vector.broadcast %80 : vector<8x1xf32> to vector<8x16xf32>
    %84 = arith.mulf %82, %83 : vector<8x16xf32>
    %85 = arith.truncf %84 : vector<8x16xf32> to vector<8x16xbf16>
    %86 = vector.extract_strided_slice %39 {offsets = [16, 0], sizes = [16, 64], strides = [1, 1]} : vector<64x64xbf16> to vector<16x64xbf16>
    %cst_31 = arith.constant dense<0.000000e+00> : vector<8x64xf32>
    %87 = tpu.matmul %85, %86, %cst_31 {dimension_numbers = #tpu.dot_dimension_numbers<[1], [0], [0], [1], [0, 0, 1, 1], [], []>} : vector<8x16xbf16>, vector<16x64xbf16>, vector<8x64xf32> -> vector<8x64xf32>
    %88 = arith.addf %64, %87 : vector<8x64xf32>
    %89 = vector.extract_strided_slice %37 {offsets = [0, 32], sizes = [8, 16], strides = [1, 1]} : vector<8x192xf32> to vector<8x16xf32>
    %90 = arith.truncf %89 : vector<8x16xf32> to vector<8x16xbf16>
    %91 = vector.extract_strided_slice %37 {offsets = [0, 96], sizes = [8, 16], strides = [1, 1]} : vector<8x192xf32> to vector<8x16xf32>
    %92 = arith.truncf %91 : vector<8x16xf32> to vector<8x16xbf16>
    %93 = vector.extract_strided_slice %37 {offsets = [0, 160], sizes = [8, 16], strides = [1, 1]} : vector<8x192xf32> to vector<8x16xf32>
    %94 = arith.truncf %93 : vector<8x16xf32> to vector<8x16xbf16>
    %cst_32 = arith.constant dense<0.000000e+00> : vector<8x8xf32>
    %95 = tpu.matmul %90, %92, %cst_32 {dimension_numbers = #tpu.dot_dimension_numbers<[1], [1], [0], [0], [0, 0, 1, 0], [], []>} : vector<8x16xbf16>, vector<8x16xbf16>, vector<8x8xf32> -> vector<8x8xf32>
    %96 = arith.addf %95, %7 : vector<8x8xf32>
    %cst_33 = arith.constant dense<0xFF800000> : vector<8xf32>
    %97 = vector.multi_reduction <maximumf>, %96, %cst_33 [1] : vector<8x8xf32> to vector<8xf32>
    %98 = vector.shape_cast %97 : vector<8xf32> to vector<8x1xf32>
    %99 = vector.broadcast %98 : vector<8x1xf32> to vector<8x8xf32>
    %100 = arith.subf %96, %99 : vector<8x8xf32>
    %101 = math.exp %100 : vector<8x8xf32>
    %cst_34 = arith.constant dense<0.000000e+00> : vector<8xf32>
    %102 = vector.multi_reduction <add>, %101, %cst_34 [1] : vector<8x8xf32> to vector<8xf32>
    %103 = vector.shape_cast %102 : vector<8xf32> to vector<8x1xf32>
    %104 = tpu.reciprocal %103 {approx = true} : vector<8x1xf32> -> vector<8x1xf32>
    %105 = arith.truncf %101 : vector<8x8xf32> to vector<8x8xbf16>
    %cst_35 = arith.constant dense<0.000000e+00> : vector<8x16xf32>
    %106 = tpu.matmul %105, %94, %cst_35 {dimension_numbers = #tpu.dot_dimension_numbers<[1], [0], [0], [1], [0, 0, 1, 1], [], []>} : vector<8x8xbf16>, vector<8x16xbf16>, vector<8x16xf32> -> vector<8x16xf32>
    %107 = vector.broadcast %104 : vector<8x1xf32> to vector<8x16xf32>
    %108 = arith.mulf %106, %107 : vector<8x16xf32>
    %109 = arith.truncf %108 : vector<8x16xf32> to vector<8x16xbf16>
    %110 = vector.extract_strided_slice %39 {offsets = [32, 0], sizes = [16, 64], strides = [1, 1]} : vector<64x64xbf16> to vector<16x64xbf16>
    %cst_36 = arith.constant dense<0.000000e+00> : vector<8x64xf32>
    %111 = tpu.matmul %109, %110, %cst_36 {dimension_numbers = #tpu.dot_dimension_numbers<[1], [0], [0], [1], [0, 0, 1, 1], [], []>} : vector<8x16xbf16>, vector<16x64xbf16>, vector<8x64xf32> -> vector<8x64xf32>
    %112 = arith.addf %88, %111 : vector<8x64xf32>
    %113 = vector.extract_strided_slice %37 {offsets = [0, 48], sizes = [8, 16], strides = [1, 1]} : vector<8x192xf32> to vector<8x16xf32>
    %114 = arith.truncf %113 : vector<8x16xf32> to vector<8x16xbf16>
    %115 = vector.extract_strided_slice %37 {offsets = [0, 112], sizes = [8, 16], strides = [1, 1]} : vector<8x192xf32> to vector<8x16xf32>
    %116 = arith.truncf %115 : vector<8x16xf32> to vector<8x16xbf16>
    %117 = vector.extract_strided_slice %37 {offsets = [0, 176], sizes = [8, 16], strides = [1, 1]} : vector<8x192xf32> to vector<8x16xf32>
    %118 = arith.truncf %117 : vector<8x16xf32> to vector<8x16xbf16>
    %cst_37 = arith.constant dense<0.000000e+00> : vector<8x8xf32>
    %119 = tpu.matmul %114, %116, %cst_37 {dimension_numbers = #tpu.dot_dimension_numbers<[1], [1], [0], [0], [0, 0, 1, 0], [], []>} : vector<8x16xbf16>, vector<8x16xbf16>, vector<8x8xf32> -> vector<8x8xf32>
    %120 = arith.addf %119, %7 : vector<8x8xf32>
    %cst_38 = arith.constant dense<0xFF800000> : vector<8xf32>
    %121 = vector.multi_reduction <maximumf>, %120, %cst_38 [1] : vector<8x8xf32> to vector<8xf32>
    %122 = vector.shape_cast %121 : vector<8xf32> to vector<8x1xf32>
    %123 = vector.broadcast %122 : vector<8x1xf32> to vector<8x8xf32>
    %124 = arith.subf %120, %123 : vector<8x8xf32>
    %125 = math.exp %124 : vector<8x8xf32>
    %cst_39 = arith.constant dense<0.000000e+00> : vector<8xf32>
    %126 = vector.multi_reduction <add>, %125, %cst_39 [1] : vector<8x8xf32> to vector<8xf32>
    %127 = vector.shape_cast %126 : vector<8xf32> to vector<8x1xf32>
    %128 = tpu.reciprocal %127 {approx = true} : vector<8x1xf32> -> vector<8x1xf32>
    %129 = arith.truncf %125 : vector<8x8xf32> to vector<8x8xbf16>
    %cst_40 = arith.constant dense<0.000000e+00> : vector<8x16xf32>
    %130 = tpu.matmul %129, %118, %cst_40 {dimension_numbers = #tpu.dot_dimension_numbers<[1], [0], [0], [1], [0, 0, 1, 1], [], []>} : vector<8x8xbf16>, vector<8x16xbf16>, vector<8x16xf32> -> vector<8x16xf32>
    %131 = vector.broadcast %128 : vector<8x1xf32> to vector<8x16xf32>
    %132 = arith.mulf %130, %131 : vector<8x16xf32>
    %133 = arith.truncf %132 : vector<8x16xf32> to vector<8x16xbf16>
    %134 = vector.extract_strided_slice %39 {offsets = [48, 0], sizes = [16, 64], strides = [1, 1]} : vector<64x64xbf16> to vector<16x64xbf16>
    %cst_41 = arith.constant dense<0.000000e+00> : vector<8x64xf32>
    %135 = tpu.matmul %133, %134, %cst_41 {dimension_numbers = #tpu.dot_dimension_numbers<[1], [0], [0], [1], [0, 0, 1, 1], [], []>} : vector<8x16xbf16>, vector<16x64xbf16>, vector<8x64xf32> -> vector<8x64xf32>
    %136 = arith.addf %112, %135 : vector<8x64xf32>
    %137 = arith.addf %1, %136 : vector<8x64xf32>
    %c0_42 = arith.constant 0 : index
    %c0_43 = arith.constant 0 : index
    %c0_44 = arith.constant 0 : index
    %138 = vector.load %arg6[%c0_42, %c0_43, %c0_44] : memref<2x1x64xf32, #tpu.memory_space<vmem>>, vector<1x1x64xf32>
    %139 = vector.shape_cast %138 : vector<1x1x64xf32> to vector<1x64xf32>
    %140 = vector.broadcast %139 : vector<1x64xf32> to vector<8x64xf32>
    %141 = arith.addf %137, %140 : vector<8x64xf32>
    %c0_45 = arith.constant 0 : index
    %c0_46 = arith.constant 0 : index
    %c0_47 = arith.constant 0 : index
    %142 = vector.load %arg7[%c0_45, %c0_46, %c0_47] : memref<2x1x64xf32, #tpu.memory_space<vmem>>, vector<1x1x64xf32>
    %143 = vector.shape_cast %142 : vector<1x1x64xf32> to vector<1x64xf32>
    %c0_48 = arith.constant 0 : index
    %c0_49 = arith.constant 0 : index
    %c0_50 = arith.constant 0 : index
    %144 = vector.load %arg8[%c0_48, %c0_49, %c0_50] : memref<2x1x64xf32, #tpu.memory_space<vmem>>, vector<1x1x64xf32>
    %145 = vector.shape_cast %144 : vector<1x1x64xf32> to vector<1x64xf32>
    %cst_51 = arith.constant dense<0.000000e+00> : vector<8xf32>
    %146 = vector.multi_reduction <add>, %141, %cst_51 [1] : vector<8x64xf32> to vector<8xf32>
    %147 = vector.shape_cast %146 : vector<8xf32> to vector<8x1xf32>
    %cst_52 = arith.constant 6.400000e+01 : f32
    %148 = vector.broadcast %cst_52 : f32 to vector<8x1xf32>
    %149 = arith.divf %147, %148 : vector<8x1xf32>
    %150 = vector.broadcast %149 : vector<8x1xf32> to vector<8x64xf32>
    %151 = arith.subf %141, %150 : vector<8x64xf32>
    %152 = arith.mulf %151, %151 : vector<8x64xf32>
    %cst_53 = arith.constant dense<0.000000e+00> : vector<8xf32>
    %153 = vector.multi_reduction <add>, %152, %cst_53 [1] : vector<8x64xf32> to vector<8xf32>
    %154 = vector.shape_cast %153 : vector<8xf32> to vector<8x1xf32>
    %cst_54 = arith.constant 6.400000e+01 : f32
    %155 = vector.broadcast %cst_54 : f32 to vector<8x1xf32>
    %156 = arith.divf %154, %155 : vector<8x1xf32>
    %157 = vector.broadcast %149 : vector<8x1xf32> to vector<8x64xf32>
    %158 = arith.subf %141, %157 : vector<8x64xf32>
    %cst_55 = arith.constant 9.99999974E-6 : f32
    %159 = vector.broadcast %cst_55 : f32 to vector<8x1xf32>
    %160 = arith.addf %156, %159 : vector<8x1xf32>
    %161 = math.rsqrt %160 : vector<8x1xf32>
    %162 = vector.broadcast %161 : vector<8x1xf32> to vector<8x64xf32>
    %163 = arith.mulf %158, %162 : vector<8x64xf32>
    %164 = vector.broadcast %143 : vector<1x64xf32> to vector<8x64xf32>
    %165 = arith.mulf %163, %164 : vector<8x64xf32>
    %166 = vector.broadcast %145 : vector<1x64xf32> to vector<8x64xf32>
    %167 = arith.addf %165, %166 : vector<8x64xf32>
    %168 = arith.truncf %167 : vector<8x64xf32> to vector<8x64xbf16>
    %c0_56 = arith.constant 0 : index
    %c0_57 = arith.constant 0 : index
    %c0_58 = arith.constant 0 : index
    %169 = vector.load %arg9[%c0_56, %c0_57, %c0_58] : memref<2x64x256xbf16, #tpu.memory_space<vmem>>, vector<1x64x256xbf16>
    %170 = vector.shape_cast %169 : vector<1x64x256xbf16> to vector<64x256xbf16>
    %cst_59 = arith.constant dense<0.000000e+00> : vector<8x256xf32>
    %171 = tpu.matmul %168, %170, %cst_59 {dimension_numbers = #tpu.dot_dimension_numbers<[1], [0], [0], [1], [0, 0, 1, 1], [], []>} : vector<8x64xbf16>, vector<64x256xbf16>, vector<8x256xf32> -> vector<8x256xf32>
    %c0_60 = arith.constant 0 : index
    %c0_61 = arith.constant 0 : index
    %c0_62 = arith.constant 0 : index
    %172 = vector.load %arg10[%c0_60, %c0_61, %c0_62] : memref<2x1x256xf32, #tpu.memory_space<vmem>>, vector<1x1x256xf32>
    %173 = vector.shape_cast %172 : vector<1x1x256xf32> to vector<1x256xf32>
    %174 = vector.broadcast %173 : vector<1x256xf32> to vector<8x256xf32>
    %175 = arith.addf %171, %174 : vector<8x256xf32>
    %cst_63 = arith.constant 0.000000e+00 : f32
    %176 = vector.broadcast %cst_63 : f32 to vector<8x256xf32>
    %177 = arith.maximumf %175, %176 : vector<8x256xf32>
    %178 = arith.truncf %177 : vector<8x256xf32> to vector<8x256xbf16>
    %c0_64 = arith.constant 0 : index
    %c0_65 = arith.constant 0 : index
    %c0_66 = arith.constant 0 : index
    %179 = vector.load %arg11[%c0_64, %c0_65, %c0_66] : memref<2x256x64xbf16, #tpu.memory_space<vmem>>, vector<1x256x64xbf16>
    %180 = vector.shape_cast %179 : vector<1x256x64xbf16> to vector<256x64xbf16>
    %cst_67 = arith.constant dense<0.000000e+00> : vector<8x64xf32>
    %181 = tpu.matmul %178, %180, %cst_67 {dimension_numbers = #tpu.dot_dimension_numbers<[1], [0], [0], [1], [0, 0, 1, 1], [], []>} : vector<8x256xbf16>, vector<256x64xbf16>, vector<8x64xf32> -> vector<8x64xf32>
    %182 = arith.addf %141, %181 : vector<8x64xf32>
    %c0_68 = arith.constant 0 : index
    %c0_69 = arith.constant 0 : index
    %c0_70 = arith.constant 0 : index
    %183 = vector.load %arg12[%c0_68, %c0_69, %c0_70] : memref<2x1x64xf32, #tpu.memory_space<vmem>>, vector<1x1x64xf32>
    %184 = vector.shape_cast %183 : vector<1x1x64xf32> to vector<1x64xf32>
    %185 = vector.broadcast %184 : vector<1x64xf32> to vector<8x64xf32>
    %186 = arith.addf %182, %185 : vector<8x64xf32>
    %c1 = arith.constant 1 : index
    %c0_71 = arith.constant 0 : index
    %c0_72 = arith.constant 0 : index
    %187 = vector.load %arg2[%c1, %c0_71, %c0_72] : memref<2x1x64xf32, #tpu.memory_space<vmem>>, vector<1x1x64xf32>
    %188 = vector.shape_cast %187 : vector<1x1x64xf32> to vector<1x64xf32>
    %c1_73 = arith.constant 1 : index
    %c0_74 = arith.constant 0 : index
    %c0_75 = arith.constant 0 : index
    %189 = vector.load %arg3[%c1_73, %c0_74, %c0_75] : memref<2x1x64xf32, #tpu.memory_space<vmem>>, vector<1x1x64xf32>
    %190 = vector.shape_cast %189 : vector<1x1x64xf32> to vector<1x64xf32>
    %cst_76 = arith.constant dense<0.000000e+00> : vector<8xf32>
    %191 = vector.multi_reduction <add>, %186, %cst_76 [1] : vector<8x64xf32> to vector<8xf32>
    %192 = vector.shape_cast %191 : vector<8xf32> to vector<8x1xf32>
    %cst_77 = arith.constant 6.400000e+01 : f32
    %193 = vector.broadcast %cst_77 : f32 to vector<8x1xf32>
    %194 = arith.divf %192, %193 : vector<8x1xf32>
    %195 = vector.broadcast %194 : vector<8x1xf32> to vector<8x64xf32>
    %196 = arith.subf %186, %195 : vector<8x64xf32>
    %197 = arith.mulf %196, %196 : vector<8x64xf32>
    %cst_78 = arith.constant dense<0.000000e+00> : vector<8xf32>
    %198 = vector.multi_reduction <add>, %197, %cst_78 [1] : vector<8x64xf32> to vector<8xf32>
    %199 = vector.shape_cast %198 : vector<8xf32> to vector<8x1xf32>
    %cst_79 = arith.constant 6.400000e+01 : f32
    %200 = vector.broadcast %cst_79 : f32 to vector<8x1xf32>
    %201 = arith.divf %199, %200 : vector<8x1xf32>
    %202 = vector.broadcast %194 : vector<8x1xf32> to vector<8x64xf32>
    %203 = arith.subf %186, %202 : vector<8x64xf32>
    %cst_80 = arith.constant 9.99999974E-6 : f32
    %204 = vector.broadcast %cst_80 : f32 to vector<8x1xf32>
    %205 = arith.addf %201, %204 : vector<8x1xf32>
    %206 = math.rsqrt %205 : vector<8x1xf32>
    %207 = vector.broadcast %206 : vector<8x1xf32> to vector<8x64xf32>
    %208 = arith.mulf %203, %207 : vector<8x64xf32>
    %209 = vector.broadcast %188 : vector<1x64xf32> to vector<8x64xf32>
    %210 = arith.mulf %208, %209 : vector<8x64xf32>
    %211 = vector.broadcast %190 : vector<1x64xf32> to vector<8x64xf32>
    %212 = arith.addf %210, %211 : vector<8x64xf32>
    %213 = arith.truncf %212 : vector<8x64xf32> to vector<8x64xbf16>
    %c1_81 = arith.constant 1 : index
    %c0_82 = arith.constant 0 : index
    %c0_83 = arith.constant 0 : index
    %214 = vector.load %arg4[%c1_81, %c0_82, %c0_83] : memref<2x64x192xbf16, #tpu.memory_space<vmem>>, vector<1x64x192xbf16>
    %215 = vector.shape_cast %214 : vector<1x64x192xbf16> to vector<64x192xbf16>
    %cst_84 = arith.constant dense<0.000000e+00> : vector<8x192xf32>
    %216 = tpu.matmul %213, %215, %cst_84 {dimension_numbers = #tpu.dot_dimension_numbers<[1], [0], [0], [1], [0, 0, 1, 1], [], []>} : vector<8x64xbf16>, vector<64x192xbf16>, vector<8x192xf32> -> vector<8x192xf32>
    %c1_85 = arith.constant 1 : index
    %c0_86 = arith.constant 0 : index
    %c0_87 = arith.constant 0 : index
    %217 = vector.load %arg5[%c1_85, %c0_86, %c0_87] : memref<2x64x64xbf16, #tpu.memory_space<vmem>>, vector<1x64x64xbf16>
    %218 = vector.shape_cast %217 : vector<1x64x64xbf16> to vector<64x64xbf16>
    %cst_88 = arith.constant 0.000000e+00 : f32
    %219 = vector.broadcast %cst_88 : f32 to vector<8x64xf32>
    %220 = vector.extract_strided_slice %216 {offsets = [0, 0], sizes = [8, 16], strides = [1, 1]} : vector<8x192xf32> to vector<8x16xf32>
    %221 = arith.truncf %220 : vector<8x16xf32> to vector<8x16xbf16>
    %222 = vector.extract_strided_slice %216 {offsets = [0, 64], sizes = [8, 16], strides = [1, 1]} : vector<8x192xf32> to vector<8x16xf32>
    %223 = arith.truncf %222 : vector<8x16xf32> to vector<8x16xbf16>
    %224 = vector.extract_strided_slice %216 {offsets = [0, 128], sizes = [8, 16], strides = [1, 1]} : vector<8x192xf32> to vector<8x16xf32>
    %225 = arith.truncf %224 : vector<8x16xf32> to vector<8x16xbf16>
    %cst_89 = arith.constant dense<0.000000e+00> : vector<8x8xf32>
    %226 = tpu.matmul %221, %223, %cst_89 {dimension_numbers = #tpu.dot_dimension_numbers<[1], [1], [0], [0], [0, 0, 1, 0], [], []>} : vector<8x16xbf16>, vector<8x16xbf16>, vector<8x8xf32> -> vector<8x8xf32>
    %227 = arith.addf %226, %7 : vector<8x8xf32>
    %cst_90 = arith.constant dense<0xFF800000> : vector<8xf32>
    %228 = vector.multi_reduction <maximumf>, %227, %cst_90 [1] : vector<8x8xf32> to vector<8xf32>
    %229 = vector.shape_cast %228 : vector<8xf32> to vector<8x1xf32>
    %230 = vector.broadcast %229 : vector<8x1xf32> to vector<8x8xf32>
    %231 = arith.subf %227, %230 : vector<8x8xf32>
    %232 = math.exp %231 : vector<8x8xf32>
    %cst_91 = arith.constant dense<0.000000e+00> : vector<8xf32>
    %233 = vector.multi_reduction <add>, %232, %cst_91 [1] : vector<8x8xf32> to vector<8xf32>
    %234 = vector.shape_cast %233 : vector<8xf32> to vector<8x1xf32>
    %235 = tpu.reciprocal %234 {approx = true} : vector<8x1xf32> -> vector<8x1xf32>
    %236 = arith.truncf %232 : vector<8x8xf32> to vector<8x8xbf16>
    %cst_92 = arith.constant dense<0.000000e+00> : vector<8x16xf32>
    %237 = tpu.matmul %236, %225, %cst_92 {dimension_numbers = #tpu.dot_dimension_numbers<[1], [0], [0], [1], [0, 0, 1, 1], [], []>} : vector<8x8xbf16>, vector<8x16xbf16>, vector<8x16xf32> -> vector<8x16xf32>
    %238 = vector.broadcast %235 : vector<8x1xf32> to vector<8x16xf32>
    %239 = arith.mulf %237, %238 : vector<8x16xf32>
    %240 = arith.truncf %239 : vector<8x16xf32> to vector<8x16xbf16>
    %241 = vector.extract_strided_slice %218 {offsets = [0, 0], sizes = [16, 64], strides = [1, 1]} : vector<64x64xbf16> to vector<16x64xbf16>
    %cst_93 = arith.constant dense<0.000000e+00> : vector<8x64xf32>
    %242 = tpu.matmul %240, %241, %cst_93 {dimension_numbers = #tpu.dot_dimension_numbers<[1], [0], [0], [1], [0, 0, 1, 1], [], []>} : vector<8x16xbf16>, vector<16x64xbf16>, vector<8x64xf32> -> vector<8x64xf32>
    %243 = arith.addf %219, %242 : vector<8x64xf32>
    %244 = vector.extract_strided_slice %216 {offsets = [0, 16], sizes = [8, 16], strides = [1, 1]} : vector<8x192xf32> to vector<8x16xf32>
    %245 = arith.truncf %244 : vector<8x16xf32> to vector<8x16xbf16>
    %246 = vector.extract_strided_slice %216 {offsets = [0, 80], sizes = [8, 16], strides = [1, 1]} : vector<8x192xf32> to vector<8x16xf32>
    %247 = arith.truncf %246 : vector<8x16xf32> to vector<8x16xbf16>
    %248 = vector.extract_strided_slice %216 {offsets = [0, 144], sizes = [8, 16], strides = [1, 1]} : vector<8x192xf32> to vector<8x16xf32>
    %249 = arith.truncf %248 : vector<8x16xf32> to vector<8x16xbf16>
    %cst_94 = arith.constant dense<0.000000e+00> : vector<8x8xf32>
    %250 = tpu.matmul %245, %247, %cst_94 {dimension_numbers = #tpu.dot_dimension_numbers<[1], [1], [0], [0], [0, 0, 1, 0], [], []>} : vector<8x16xbf16>, vector<8x16xbf16>, vector<8x8xf32> -> vector<8x8xf32>
    %251 = arith.addf %250, %7 : vector<8x8xf32>
    %cst_95 = arith.constant dense<0xFF800000> : vector<8xf32>
    %252 = vector.multi_reduction <maximumf>, %251, %cst_95 [1] : vector<8x8xf32> to vector<8xf32>
    %253 = vector.shape_cast %252 : vector<8xf32> to vector<8x1xf32>
    %254 = vector.broadcast %253 : vector<8x1xf32> to vector<8x8xf32>
    %255 = arith.subf %251, %254 : vector<8x8xf32>
    %256 = math.exp %255 : vector<8x8xf32>
    %cst_96 = arith.constant dense<0.000000e+00> : vector<8xf32>
    %257 = vector.multi_reduction <add>, %256, %cst_96 [1] : vector<8x8xf32> to vector<8xf32>
    %258 = vector.shape_cast %257 : vector<8xf32> to vector<8x1xf32>
    %259 = tpu.reciprocal %258 {approx = true} : vector<8x1xf32> -> vector<8x1xf32>
    %260 = arith.truncf %256 : vector<8x8xf32> to vector<8x8xbf16>
    %cst_97 = arith.constant dense<0.000000e+00> : vector<8x16xf32>
    %261 = tpu.matmul %260, %249, %cst_97 {dimension_numbers = #tpu.dot_dimension_numbers<[1], [0], [0], [1], [0, 0, 1, 1], [], []>} : vector<8x8xbf16>, vector<8x16xbf16>, vector<8x16xf32> -> vector<8x16xf32>
    %262 = vector.broadcast %259 : vector<8x1xf32> to vector<8x16xf32>
    %263 = arith.mulf %261, %262 : vector<8x16xf32>
    %264 = arith.truncf %263 : vector<8x16xf32> to vector<8x16xbf16>
    %265 = vector.extract_strided_slice %218 {offsets = [16, 0], sizes = [16, 64], strides = [1, 1]} : vector<64x64xbf16> to vector<16x64xbf16>
    %cst_98 = arith.constant dense<0.000000e+00> : vector<8x64xf32>
    %266 = tpu.matmul %264, %265, %cst_98 {dimension_numbers = #tpu.dot_dimension_numbers<[1], [0], [0], [1], [0, 0, 1, 1], [], []>} : vector<8x16xbf16>, vector<16x64xbf16>, vector<8x64xf32> -> vector<8x64xf32>
    %267 = arith.addf %243, %266 : vector<8x64xf32>
    %268 = vector.extract_strided_slice %216 {offsets = [0, 32], sizes = [8, 16], strides = [1, 1]} : vector<8x192xf32> to vector<8x16xf32>
    %269 = arith.truncf %268 : vector<8x16xf32> to vector<8x16xbf16>
    %270 = vector.extract_strided_slice %216 {offsets = [0, 96], sizes = [8, 16], strides = [1, 1]} : vector<8x192xf32> to vector<8x16xf32>
    %271 = arith.truncf %270 : vector<8x16xf32> to vector<8x16xbf16>
    %272 = vector.extract_strided_slice %216 {offsets = [0, 160], sizes = [8, 16], strides = [1, 1]} : vector<8x192xf32> to vector<8x16xf32>
    %273 = arith.truncf %272 : vector<8x16xf32> to vector<8x16xbf16>
    %cst_99 = arith.constant dense<0.000000e+00> : vector<8x8xf32>
    %274 = tpu.matmul %269, %271, %cst_99 {dimension_numbers = #tpu.dot_dimension_numbers<[1], [1], [0], [0], [0, 0, 1, 0], [], []>} : vector<8x16xbf16>, vector<8x16xbf16>, vector<8x8xf32> -> vector<8x8xf32>
    %275 = arith.addf %274, %7 : vector<8x8xf32>
    %cst_100 = arith.constant dense<0xFF800000> : vector<8xf32>
    %276 = vector.multi_reduction <maximumf>, %275, %cst_100 [1] : vector<8x8xf32> to vector<8xf32>
    %277 = vector.shape_cast %276 : vector<8xf32> to vector<8x1xf32>
    %278 = vector.broadcast %277 : vector<8x1xf32> to vector<8x8xf32>
    %279 = arith.subf %275, %278 : vector<8x8xf32>
    %280 = math.exp %279 : vector<8x8xf32>
    %cst_101 = arith.constant dense<0.000000e+00> : vector<8xf32>
    %281 = vector.multi_reduction <add>, %280, %cst_101 [1] : vector<8x8xf32> to vector<8xf32>
    %282 = vector.shape_cast %281 : vector<8xf32> to vector<8x1xf32>
    %283 = tpu.reciprocal %282 {approx = true} : vector<8x1xf32> -> vector<8x1xf32>
    %284 = arith.truncf %280 : vector<8x8xf32> to vector<8x8xbf16>
    %cst_102 = arith.constant dense<0.000000e+00> : vector<8x16xf32>
    %285 = tpu.matmul %284, %273, %cst_102 {dimension_numbers = #tpu.dot_dimension_numbers<[1], [0], [0], [1], [0, 0, 1, 1], [], []>} : vector<8x8xbf16>, vector<8x16xbf16>, vector<8x16xf32> -> vector<8x16xf32>
    %286 = vector.broadcast %283 : vector<8x1xf32> to vector<8x16xf32>
    %287 = arith.mulf %285, %286 : vector<8x16xf32>
    %288 = arith.truncf %287 : vector<8x16xf32> to vector<8x16xbf16>
    %289 = vector.extract_strided_slice %218 {offsets = [32, 0], sizes = [16, 64], strides = [1, 1]} : vector<64x64xbf16> to vector<16x64xbf16>
    %cst_103 = arith.constant dense<0.000000e+00> : vector<8x64xf32>
    %290 = tpu.matmul %288, %289, %cst_103 {dimension_numbers = #tpu.dot_dimension_numbers<[1], [0], [0], [1], [0, 0, 1, 1], [], []>} : vector<8x16xbf16>, vector<16x64xbf16>, vector<8x64xf32> -> vector<8x64xf32>
    %291 = arith.addf %267, %290 : vector<8x64xf32>
    %292 = vector.extract_strided_slice %216 {offsets = [0, 48], sizes = [8, 16], strides = [1, 1]} : vector<8x192xf32> to vector<8x16xf32>
    %293 = arith.truncf %292 : vector<8x16xf32> to vector<8x16xbf16>
    %294 = vector.extract_strided_slice %216 {offsets = [0, 112], sizes = [8, 16], strides = [1, 1]} : vector<8x192xf32> to vector<8x16xf32>
    %295 = arith.truncf %294 : vector<8x16xf32> to vector<8x16xbf16>
    %296 = vector.extract_strided_slice %216 {offsets = [0, 176], sizes = [8, 16], strides = [1, 1]} : vector<8x192xf32> to vector<8x16xf32>
    %297 = arith.truncf %296 : vector<8x16xf32> to vector<8x16xbf16>
    %cst_104 = arith.constant dense<0.000000e+00> : vector<8x8xf32>
    %298 = tpu.matmul %293, %295, %cst_104 {dimension_numbers = #tpu.dot_dimension_numbers<[1], [1], [0], [0], [0, 0, 1, 0], [], []>} : vector<8x16xbf16>, vector<8x16xbf16>, vector<8x8xf32> -> vector<8x8xf32>
    %299 = arith.addf %298, %7 : vector<8x8xf32>
    %cst_105 = arith.constant dense<0xFF800000> : vector<8xf32>
    %300 = vector.multi_reduction <maximumf>, %299, %cst_105 [1] : vector<8x8xf32> to vector<8xf32>
    %301 = vector.shape_cast %300 : vector<8xf32> to vector<8x1xf32>
    %302 = vector.broadcast %301 : vector<8x1xf32> to vector<8x8xf32>
    %303 = arith.subf %299, %302 : vector<8x8xf32>
    %304 = math.exp %303 : vector<8x8xf32>
    %cst_106 = arith.constant dense<0.000000e+00> : vector<8xf32>
    %305 = vector.multi_reduction <add>, %304, %cst_106 [1] : vector<8x8xf32> to vector<8xf32>
    %306 = vector.shape_cast %305 : vector<8xf32> to vector<8x1xf32>
    %307 = tpu.reciprocal %306 {approx = true} : vector<8x1xf32> -> vector<8x1xf32>
    %308 = arith.truncf %304 : vector<8x8xf32> to vector<8x8xbf16>
    %cst_107 = arith.constant dense<0.000000e+00> : vector<8x16xf32>
    %309 = tpu.matmul %308, %297, %cst_107 {dimension_numbers = #tpu.dot_dimension_numbers<[1], [0], [0], [1], [0, 0, 1, 1], [], []>} : vector<8x8xbf16>, vector<8x16xbf16>, vector<8x16xf32> -> vector<8x16xf32>
    %310 = vector.broadcast %307 : vector<8x1xf32> to vector<8x16xf32>
    %311 = arith.mulf %309, %310 : vector<8x16xf32>
    %312 = arith.truncf %311 : vector<8x16xf32> to vector<8x16xbf16>
    %313 = vector.extract_strided_slice %218 {offsets = [48, 0], sizes = [16, 64], strides = [1, 1]} : vector<64x64xbf16> to vector<16x64xbf16>
    %cst_108 = arith.constant dense<0.000000e+00> : vector<8x64xf32>
    %314 = tpu.matmul %312, %313, %cst_108 {dimension_numbers = #tpu.dot_dimension_numbers<[1], [0], [0], [1], [0, 0, 1, 1], [], []>} : vector<8x16xbf16>, vector<16x64xbf16>, vector<8x64xf32> -> vector<8x64xf32>
    %315 = arith.addf %291, %314 : vector<8x64xf32>
    %316 = arith.addf %186, %315 : vector<8x64xf32>
    %c1_109 = arith.constant 1 : index
    %c0_110 = arith.constant 0 : index
    %c0_111 = arith.constant 0 : index
    %317 = vector.load %arg6[%c1_109, %c0_110, %c0_111] : memref<2x1x64xf32, #tpu.memory_space<vmem>>, vector<1x1x64xf32>
    %318 = vector.shape_cast %317 : vector<1x1x64xf32> to vector<1x64xf32>
    %319 = vector.broadcast %318 : vector<1x64xf32> to vector<8x64xf32>
    %320 = arith.addf %316, %319 : vector<8x64xf32>
    %c1_112 = arith.constant 1 : index
    %c0_113 = arith.constant 0 : index
    %c0_114 = arith.constant 0 : index
    %321 = vector.load %arg7[%c1_112, %c0_113, %c0_114] : memref<2x1x64xf32, #tpu.memory_space<vmem>>, vector<1x1x64xf32>
    %322 = vector.shape_cast %321 : vector<1x1x64xf32> to vector<1x64xf32>
    %c1_115 = arith.constant 1 : index
    %c0_116 = arith.constant 0 : index
    %c0_117 = arith.constant 0 : index
    %323 = vector.load %arg8[%c1_115, %c0_116, %c0_117] : memref<2x1x64xf32, #tpu.memory_space<vmem>>, vector<1x1x64xf32>
    %324 = vector.shape_cast %323 : vector<1x1x64xf32> to vector<1x64xf32>
    %cst_118 = arith.constant dense<0.000000e+00> : vector<8xf32>
    %325 = vector.multi_reduction <add>, %320, %cst_118 [1] : vector<8x64xf32> to vector<8xf32>
    %326 = vector.shape_cast %325 : vector<8xf32> to vector<8x1xf32>
    %cst_119 = arith.constant 6.400000e+01 : f32
    %327 = vector.broadcast %cst_119 : f32 to vector<8x1xf32>
    %328 = arith.divf %326, %327 : vector<8x1xf32>
    %329 = vector.broadcast %328 : vector<8x1xf32> to vector<8x64xf32>
    %330 = arith.subf %320, %329 : vector<8x64xf32>
    %331 = arith.mulf %330, %330 : vector<8x64xf32>
    %cst_120 = arith.constant dense<0.000000e+00> : vector<8xf32>
    %332 = vector.multi_reduction <add>, %331, %cst_120 [1] : vector<8x64xf32> to vector<8xf32>
    %333 = vector.shape_cast %332 : vector<8xf32> to vector<8x1xf32>
    %cst_121 = arith.constant 6.400000e+01 : f32
    %334 = vector.broadcast %cst_121 : f32 to vector<8x1xf32>
    %335 = arith.divf %333, %334 : vector<8x1xf32>
    %336 = vector.broadcast %328 : vector<8x1xf32> to vector<8x64xf32>
    %337 = arith.subf %320, %336 : vector<8x64xf32>
    %cst_122 = arith.constant 9.99999974E-6 : f32
    %338 = vector.broadcast %cst_122 : f32 to vector<8x1xf32>
    %339 = arith.addf %335, %338 : vector<8x1xf32>
    %340 = math.rsqrt %339 : vector<8x1xf32>
    %341 = vector.broadcast %340 : vector<8x1xf32> to vector<8x64xf32>
    %342 = arith.mulf %337, %341 : vector<8x64xf32>
    %343 = vector.broadcast %322 : vector<1x64xf32> to vector<8x64xf32>
    %344 = arith.mulf %342, %343 : vector<8x64xf32>
    %345 = vector.broadcast %324 : vector<1x64xf32> to vector<8x64xf32>
    %346 = arith.addf %344, %345 : vector<8x64xf32>
    %347 = arith.truncf %346 : vector<8x64xf32> to vector<8x64xbf16>
    %c1_123 = arith.constant 1 : index
    %c0_124 = arith.constant 0 : index
    %c0_125 = arith.constant 0 : index
    %348 = vector.load %arg9[%c1_123, %c0_124, %c0_125] : memref<2x64x256xbf16, #tpu.memory_space<vmem>>, vector<1x64x256xbf16>
    %349 = vector.shape_cast %348 : vector<1x64x256xbf16> to vector<64x256xbf16>
    %cst_126 = arith.constant dense<0.000000e+00> : vector<8x256xf32>
    %350 = tpu.matmul %347, %349, %cst_126 {dimension_numbers = #tpu.dot_dimension_numbers<[1], [0], [0], [1], [0, 0, 1, 1], [], []>} : vector<8x64xbf16>, vector<64x256xbf16>, vector<8x256xf32> -> vector<8x256xf32>
    %c1_127 = arith.constant 1 : index
    %c0_128 = arith.constant 0 : index
    %c0_129 = arith.constant 0 : index
    %351 = vector.load %arg10[%c1_127, %c0_128, %c0_129] : memref<2x1x256xf32, #tpu.memory_space<vmem>>, vector<1x1x256xf32>
    %352 = vector.shape_cast %351 : vector<1x1x256xf32> to vector<1x256xf32>
    %353 = vector.broadcast %352 : vector<1x256xf32> to vector<8x256xf32>
    %354 = arith.addf %350, %353 : vector<8x256xf32>
    %cst_130 = arith.constant 0.000000e+00 : f32
    %355 = vector.broadcast %cst_130 : f32 to vector<8x256xf32>
    %356 = arith.maximumf %354, %355 : vector<8x256xf32>
    %357 = arith.truncf %356 : vector<8x256xf32> to vector<8x256xbf16>
    %c1_131 = arith.constant 1 : index
    %c0_132 = arith.constant 0 : index
    %c0_133 = arith.constant 0 : index
    %358 = vector.load %arg11[%c1_131, %c0_132, %c0_133] : memref<2x256x64xbf16, #tpu.memory_space<vmem>>, vector<1x256x64xbf16>
    %359 = vector.shape_cast %358 : vector<1x256x64xbf16> to vector<256x64xbf16>
    %cst_134 = arith.constant dense<0.000000e+00> : vector<8x64xf32>
    %360 = tpu.matmul %357, %359, %cst_134 {dimension_numbers = #tpu.dot_dimension_numbers<[1], [0], [0], [1], [0, 0, 1, 1], [], []>} : vector<8x256xbf16>, vector<256x64xbf16>, vector<8x64xf32> -> vector<8x64xf32>
    %361 = arith.addf %320, %360 : vector<8x64xf32>
    %c1_135 = arith.constant 1 : index
    %c0_136 = arith.constant 0 : index
    %c0_137 = arith.constant 0 : index
    %362 = vector.load %arg12[%c1_135, %c0_136, %c0_137] : memref<2x1x64xf32, #tpu.memory_space<vmem>>, vector<1x1x64xf32>
    %363 = vector.shape_cast %362 : vector<1x1x64xf32> to vector<1x64xf32>
    %364 = vector.broadcast %363 : vector<1x64xf32> to vector<8x64xf32>
    %365 = arith.addf %361, %364 : vector<8x64xf32>
    %c0_138 = arith.constant 0 : index
    %c0_139 = arith.constant 0 : index
    %366 = vector.load %arg13[%c0_138, %c0_139] : memref<1x64xf32, #tpu.memory_space<vmem>>, vector<1x64xf32>
    %c0_140 = arith.constant 0 : index
    %c0_141 = arith.constant 0 : index
    %367 = vector.load %arg14[%c0_140, %c0_141] : memref<1x64xf32, #tpu.memory_space<vmem>>, vector<1x64xf32>
    %cst_142 = arith.constant dense<0.000000e+00> : vector<8xf32>
    %368 = vector.multi_reduction <add>, %365, %cst_142 [1] : vector<8x64xf32> to vector<8xf32>
    %369 = vector.shape_cast %368 : vector<8xf32> to vector<8x1xf32>
    %cst_143 = arith.constant 6.400000e+01 : f32
    %370 = vector.broadcast %cst_143 : f32 to vector<8x1xf32>
    %371 = arith.divf %369, %370 : vector<8x1xf32>
    %372 = vector.broadcast %371 : vector<8x1xf32> to vector<8x64xf32>
    %373 = arith.subf %365, %372 : vector<8x64xf32>
    %374 = arith.mulf %373, %373 : vector<8x64xf32>
    %cst_144 = arith.constant dense<0.000000e+00> : vector<8xf32>
    %375 = vector.multi_reduction <add>, %374, %cst_144 [1] : vector<8x64xf32> to vector<8xf32>
    %376 = vector.shape_cast %375 : vector<8xf32> to vector<8x1xf32>
    %cst_145 = arith.constant 6.400000e+01 : f32
    %377 = vector.broadcast %cst_145 : f32 to vector<8x1xf32>
    %378 = arith.divf %376, %377 : vector<8x1xf32>
    %379 = vector.broadcast %371 : vector<8x1xf32> to vector<8x64xf32>
    %380 = arith.subf %365, %379 : vector<8x64xf32>
    %cst_146 = arith.constant 9.99999974E-6 : f32
    %381 = vector.broadcast %cst_146 : f32 to vector<8x1xf32>
    %382 = arith.addf %378, %381 : vector<8x1xf32>
    %383 = math.rsqrt %382 : vector<8x1xf32>
    %384 = vector.broadcast %383 : vector<8x1xf32> to vector<8x64xf32>
    %385 = arith.mulf %380, %384 : vector<8x64xf32>
    %386 = vector.broadcast %366 : vector<1x64xf32> to vector<8x64xf32>
    %387 = arith.mulf %385, %386 : vector<8x64xf32>
    %388 = vector.broadcast %367 : vector<1x64xf32> to vector<8x64xf32>
    %389 = arith.addf %387, %388 : vector<8x64xf32>
    %390 = arith.truncf %389 : vector<8x64xf32> to vector<8x64xbf16>
    %c0_147 = arith.constant 0 : index
    %c0_148 = arith.constant 0 : index
    %391 = vector.load %arg15[%c0_147, %c0_148] : memref<64x128xbf16, #tpu.memory_space<vmem>>, vector<64x128xbf16>
    %cst_149 = arith.constant dense<0.000000e+00> : vector<8x128xf32>
    %392 = tpu.matmul %390, %391, %cst_149 {dimension_numbers = #tpu.dot_dimension_numbers<[1], [0], [0], [1], [0, 0, 1, 1], [], []>} : vector<8x64xbf16>, vector<64x128xbf16>, vector<8x128xf32> -> vector<8x128xf32>
    %c0_150 = arith.constant 0 : index
    %c0_151 = arith.constant 0 : index
    %393 = vector.load %arg16[%c0_150, %c0_151] : memref<1x128xf32, #tpu.memory_space<vmem>>, vector<1x128xf32>
    %394 = vector.broadcast %393 : vector<1x128xf32> to vector<8x128xf32>
    %395 = arith.addf %392, %394 : vector<8x128xf32>
    %c0_152 = arith.constant 0 : index
    %c0_153 = arith.constant 0 : index
    %c0_154 = arith.constant 0 : index
    %396 = vector.load %arg17[%c0_152, %c0_153, %c0_154] : memref<1x8x128xf32, #tpu.memory_space<vmem>>, vector<1x8x128xf32>
    %397 = vector.shape_cast %396 : vector<1x8x128xf32> to vector<8x128xf32>
    %398 = vector.shape_cast %395 : vector<8x128xf32> to vector<1x8x128xf32>
    tpu.vector_store %arg17[%c0_152, %c0_153, %c0_154], %398 {strides = array<i32>} : memref<1x8x128xf32, #tpu.memory_space<vmem>>, vector<1x8x128xf32>,
    return
  }
  func.func @transform_0(%arg0: i32) -> (i32, i32, i32) {
    %c0_i32 = arith.constant 0 : i32
    %c0_i32_0 = arith.constant 0 : i32
    %c0_i32_1 = arith.constant 0 : i32
    return %arg0, %c0_i32, %c0_i32_0 : i32, i32, i32
  }
  func.func @transform_1(%arg0: i32) -> (i32, i32, i32) {
    %c0_i32 = arith.constant 0 : i32
    %c0_i32_0 = arith.constant 0 : i32
    %c0_i32_1 = arith.constant 0 : i32
    %c0_i32_2 = arith.constant 0 : i32
    return %c0_i32, %c0_i32_0, %c0_i32_1 : i32, i32, i32
  }
  func.func @transform_2(%arg0: i32) -> (i32, i32, i32) {
    %c0_i32 = arith.constant 0 : i32
    %c0_i32_0 = arith.constant 0 : i32
    %c0_i32_1 = arith.constant 0 : i32
    %c0_i32_2 = arith.constant 0 : i32
    return %c0_i32, %c0_i32_0, %c0_i32_1 : i32, i32, i32
  }
  func.func @transform_3(%arg0: i32) -> (i32, i32, i32) {
    %c0_i32 = arith.constant 0 : i32
    %c0_i32_0 = arith.constant 0 : i32
    %c0_i32_1 = arith.constant 0 : i32
    %c0_i32_2 = arith.constant 0 : i32
    return %c0_i32, %c0_i32_0, %c0_i32_1 : i32, i32, i32
  }
  func.func @transform_4(%arg0: i32) -> (i32, i32, i32) {
    %c0_i32 = arith.constant 0 : i32
    %c0_i32_0 = arith.constant 0 : i32
    %c0_i32_1 = arith.constant 0 : i32
    %c0_i32_2 = arith.constant 0 : i32
    return %c0_i32, %c0_i32_0, %c0_i32_1 : i32, i32, i32
  }
  func.func @transform_5(%arg0: i32) -> (i32, i32, i32) {
    %c0_i32 = arith.constant 0 : i32
    %c0_i32_0 = arith.constant 0 : i32
    %c0_i32_1 = arith.constant 0 : i32
    %c0_i32_2 = arith.constant 0 : i32
    return %c0_i32, %c0_i32_0, %c0_i32_1 : i32, i32, i32
  }
  func.func @transform_6(%arg0: i32) -> (i32, i32, i32) {
    %c0_i32 = arith.constant 0 : i32
    %c0_i32_0 = arith.constant 0 : i32
    %c0_i32_1 = arith.constant 0 : i32
    %c0_i32_2 = arith.constant 0 : i32
    return %c0_i32, %c0_i32_0, %c0_i32_1 : i32, i32, i32
  }
  func.func @transform_7(%arg0: i32) -> (i32, i32, i32) {
    %c0_i32 = arith.constant 0 : i32
    %c0_i32_0 = arith.constant 0 : i32
    %c0_i32_1 = arith.constant 0 : i32
    %c0_i32_2 = arith.constant 0 : i32
    return %c0_i32, %c0_i32_0, %c0_i32_1 : i32, i32, i32
  }
  func.func @transform_8(%arg0: i32) -> (i32, i32, i32) {
    %c0_i32 = arith.constant 0 : i32
    %c0_i32_0 = arith.constant 0 : i32
    %c0_i32_1 = arith.constant 0 : i32
    %c0_i32_2 = arith.constant 0 : i32
    return %c0_i32, %c0_i32_0, %c0_i32_1 : i32, i32, i32
  }
  func.func @transform_9(%arg0: i32) -> (i32, i32, i32) {
    %c0_i32 = arith.constant 0 : i32
    %c0_i32_0 = arith.constant 0 : i32
    %c0_i32_1 = arith.constant 0 : i32
    %c0_i32_2 = arith.constant 0 : i32
    return %c0_i32, %c0_i32_0, %c0_i32_1 : i32, i32, i32
  }
  func.func @transform_10(%arg0: i32) -> (i32, i32, i32) {
    %c0_i32 = arith.constant 0 : i32
    %c0_i32_0 = arith.constant 0 : i32
    %c0_i32_1 = arith.constant 0 : i32
    %c0_i32_2 = arith.constant 0 : i32
    return %c0_i32, %c0_i32_0, %c0_i32_1 : i32, i32, i32
  }
  func.func @transform_11(%arg0: i32) -> (i32, i32, i32) {
    %c0_i32 = arith.constant 0 : i32
    %c0_i32_0 = arith.constant 0 : i32
    %c0_i32_1 = arith.constant 0 : i32
    %c0_i32_2 = arith.constant 0 : i32
    return %c0_i32, %c0_i32_0, %c0_i32_1 : i32, i32, i32
  }
  func.func @transform_12(%arg0: i32) -> (i32, i32) {
    %c0_i32 = arith.constant 0 : i32
    %c0_i32_0 = arith.constant 0 : i32
    %c0_i32_1 = arith.constant 0 : i32
    return %c0_i32, %c0_i32_0 : i32, i32
  }
  func.func @transform_13(%arg0: i32) -> (i32, i32) {
    %c0_i32 = arith.constant 0 : i32
    %c0_i32_0 = arith.constant 0 : i32
    %c0_i32_1 = arith.constant 0 : i32
    return %c0_i32, %c0_i32_0 : i32, i32
  }
  func.func @transform_14(%arg0: i32) -> (i32, i32) {
    %c0_i32 = arith.constant 0 : i32
    %c0_i32_0 = arith.constant 0 : i32
    %c0_i32_1 = arith.constant 0 : i32
    return %c0_i32, %c0_i32_0 : i32, i32
  }
  func.func @transform_15(%arg0: i32) -> (i32, i32) {
    %c0_i32 = arith.constant 0 : i32
    %c0_i32_0 = arith.constant 0 : i32
    %c0_i32_1 = arith.constant 0 : i32
    return %c0_i32, %c0_i32_0 : i32, i32
  }
  func.func @transform_16(%arg0: i32) -> (i32, i32, i32) {
    %c0_i32 = arith.constant 0 : i32
    %c0_i32_0 = arith.constant 0 : i32
    %c0_i32_1 = arith.constant 0 : i32
    return %arg0, %c0_i32, %c0_i32_0 : i32, i32, i32
  }
}

</mosaic_0001>

<bundles_post_ra>
// kernel: tpu_custom_call.1
= control target key start
LH: loop header
LB: loop body
LE: loop exit
PB: predicated region body
PF: predicated region fallthrough
CT: control target
= control target key end

     0   :  { %s4343_s0 = inlined_call_operand.vmem [shape: f32[2,8,64], index: 0, kind: input, shape index: {}]   ;;  %s4344_s1 = inlined_call_operand.vmem [shape: f32[2,1,64], index: 1, kind: input, shape index: {}]   ;;  %s4345_s2 = inlined_call_operand.vmem [shape: f32[2,1,64], index: 2, kind: input, shape index: {}]   ;;  %s4346_s3 = inlined_call_operand.vmem [shape: bf16[2,64,192], index: 3, kind: input, shape index: {}]   ;;  %s4347_s4 = inlined_call_operand.vmem [shape: bf16[2,64,64], index: 4, kind: input, shape index: {}]   ;;  %s4348_s5 = inlined_call_operand.vmem [shape: f32[2,1,64], index: 5, kind: input, shape index: {}]   ;;  %s4349_s6 = inlined_call_operand.vmem [shape: f32[2,1,64], index: 6, kind: input, shape index: {}]   ;;  %s4350_s7 = inlined_call_operand.vmem [shape: f32[2,1,64], index: 7, kind: input, shape index: {}]   ;;  %s4351_s8 = inlined_call_operand.vmem [shape: bf16[2,64,256], index: 8, kind: input, shape index: {}]   ;;  %s4352_s9 = inlined_call_operand.vmem [shape: f32[2,1,256], index: 9, kind: input, shape index: {}]   ;;  %s4353_s10 = inlined_call_operand.vmem [shape: bf16[2,256,64], index: 10, kind: input, shape index: {}]   ;;  %s4354_s11 = inlined_call_operand.vmem [shape: f32[2,1,64], index: 11, kind: input, shape index: {}]   ;;  %s4355_s12 = inlined_call_operand.vmem [shape: f32[1,64], index: 12, kind: input, shape index: {}]   ;;  %s4356_s13 = inlined_call_operand.vmem [shape: f32[1,64], index: 13, kind: input, shape index: {}]   ;;  %s4357_s14 = inlined_call_operand.vmem [shape: bf16[64,128], index: 14, kind: input, shape index: {}]   ;;  %s4358_s15 = inlined_call_operand.vmem [shape: f32[1,128], index: 15, kind: input, shape index: {}]   ;;  %s4359_s16 = inlined_call_operand.hbm [shape: f32[2,8,128], index: 16, kind: output, shape index: {}]  }
   0x1   :  { %4374 = sst [smem:[#allocation9_spill]] %s4343_s0 }
   0x2   :  { %21 = vsyncpa [#allocation3], 0 }
   0x3   :  { %23 = vsyncpa [#allocation3 + $0x1], 0  ;;  %s3710_s21 = smov 0   ;;  %s3712_s22 = smov 0  }
   0x4   :  { %s3714_s23 = smov 0   ;;  %s3716_s24 = smov 0  }
   0x5 LB: > { %4375 = sst [smem:[#allocation5_spill]] %s3607_s23  ;;  %s3731_s25 = sadd.s32 4294967295, %s3611_s24   ;;  %s3611_s24 = sphi %s3716_s24, %s4390_s24   ;;  %s3607_s23 = sphi %s3714_s23, %s4392_s23   ;;  %s3603_s22 = sphi %s3712_s22, %s4394_s22   ;;  %s3599_s21 = sphi %s3710_s21, %s4393_s21  }
   0x6   : > { %s2919_s26 = sadd.s32 4294967294, %s3611_s24   ;;  %s3735_s27 = sadd.s32 1, %s3611_s24  }
   0x7   : > { %4376 = sst [smem:[#allocation6_spill]] %s3735_s27  ;;  %s377_s28 = sadd.s32 1, %s3607_s23 }
   0x8   : > { %s374_s29 = ssub.s32 %s3611_s24, %s3735_s27  ;;  %p387_p0 = scmp.ne.s32.totalorder %s3607_s23, %s3603_s22 }
   0x9   : > { %p375_p1 = scmp.eq.s32.totalorder %s374_s29, 0  ;;  %p388_p2 = scmp.eq.s32.totalorder %s3731_s25, 1 }
   0xa   : > { %p393_p3 = scmp.ne.s32.totalorder %s3603_s22, %s3599_s21  ;;  %p394_p4 = scmp.eq.s32.totalorder %s2919_s26, 1 }
   0xb   : > { %s3746_s30 = scalar_select %p375_p1, %s3607_s23, %s377_s28  }
   0xc   : > { %p3748_p5 = por %p388_p2, %p387_p0  ;;  %p3752_p6 = por %p394_p4, %p393_p3 }
   0xd   : > { %4377 = sst [smem:[#allocation7_spill]] %s3746_s30  ;;  %p2922_p7 = scmp.ge.s32.totalorder %s3611_s24, 1 }
   0xe   : > { %s4379_s17 = scalar_select %p3752_p6, 1, 0 }
   0xf   : > { %p464_p8 = scmp.lt.s32.totalorder %s3611_s24, 3 }
  0x10   : > { %4380 = sst [smem:[#allocation8_spill]] %s4379_s17 }
  0x11   : > { %p465_p9 = pnand %p2922_p7, %p464_p8 }
  0x12   : > { %p513_p10 = scmp.lt.s32.totalorder (!%p465_p9), %s3731_s25, 1  ;;  %vm527_vm0 = vcmask (!%p465_p9), 523264   ;;  %s4381_s28 = sld [smem:[#allocation9_spill]] (!%p465_p9)  ;;  %v3415_v7 = vld [vmem:[%s4346_s3 + $0x4] ss:$8 sps:$4 sm:$0xff] (!%p465_p9)   ;;  %v3613_v11 = vmov (!%p465_p9), 0   ;;  %v519_v39 = vlaneseq (!%p465_p9) }
  0x13   : > { %468 = sbr.rel (%p465_p9) target bundleno = 6978 (0x1b42), region = 84  ;;  %v3417_v8 = vld [vmem:[%s4346_s3] ss:$8 sps:$4 sm:$0xff] (!%p465_p9)   ;;  %v3418_v9 = vld [vmem:[%s4346_s3 + $0x14] ss:$8 sps:$4 sm:$0xff] (!%p465_p9)   ;;  %608 = vmatprep.subr.bf16.mxu0 (!%p465_p9), %v3415_v7  ;;  %640 = vmatprep.mubr.bf16.mxu0 (!%p465_p9), %v3613_v11  ;;  %v3614_v26 = vmov (!%p465_p9), 0.0  }
  0x14   : > { %609 = vmatpush1.bf16.msra.mxu0 (!%p465_p9), %v3417_v8  ;;  %v3420_v10 = vld [vmem:[%s4346_s3 + $0x10] ss:$8 sps:$4 sm:$0xff] (!%p465_p9)   ;;  %v3421_v12 = vld [vmem:[%s4346_s3 + $0x24] ss:$8 sps:$4 sm:$0xff] (!%p465_p9)   ;;  %v3423_v13 = vld [vmem:[%s4346_s3 + $0x20] ss:$8 sps:$4 sm:$0xff] (!%p465_p9)   ;;  %3209 = vmatprep.subr.bf16.mxu1 (!%p465_p9), %v3614_v26 }
  0x15   : > { %610 = vmatprep.subr.bf16.mxu0 (!%p465_p9), %v3418_v9  ;;  %v3424_v14 = vld [vmem:[%s4346_s3 + $0x34] ss:$8 sps:$4 sm:$0xff] (!%p465_p9)   ;;  %v3426_v15 = vld [vmem:[%s4346_s3 + $0x30] ss:$8 sps:$4 sm:$0xff] (!%p465_p9)   ;;  %v2925_v20 = vld [vmem:[%s4344_s1] ss:$0 sm:$0xff] (!%p465_p9) }
  0x16   : > { %v2926_v22 = vld [vmem:[%s4345_s2] ss:$0 sm:$0xff] (!%p465_p9)  ;;  %vm3615_vm1 = vmmov (!%p465_p9), 0   ;;  %s4369_s26 = smov (!%p465_p9), 112   ;;  %s4362_s23 = smov (!%p465_p9), 48   ;;  %vm662_vm2 = vcmask (!%p465_p9), 130048  }
  0x17   : > { %3211 = vmatprep.mubr.msk.bf16.mxu1 (!%p465_p9), %vm3615_vm1, %v3614_v26  ;;  %vm724_vm3 = vcmask (!%p465_p9), 1043456   ;;  %v3831_v40 = vshrl.u32 (!%p465_p9), %v519_v39, 7  ;;  %v522_v41 = vand.u32 (!%p465_p9), 127, %v519_v39  ;;  %v3619_v42 = vmov (!%p465_p9), -1e+30   ;;  %s4366_s30 = smov (!%p465_p9), 96  }
  0x18   : > { %611 = vmatpush1.bf16.msra.mxu0 (!%p465_p9), %v3420_v10  ;;  %vm709_vm5 = vcmask (!%p465_p9), 64512   ;;  %v3427_v7 = vld [vmem:[%s4347_s4] sm:$0xff] (!%p465_p9)   ;;  %v3428_v8 = vld [vmem:[%s4347_s4 + $0x8] sm:$0xff] (!%p465_p9)   ;;  %s4384_s27 = smov (!%p465_p9), 48   ;;  %s4385_s17 = smov (!%p465_p9), 32  }
  0x19   : > { %612 = vmatprep.subr.bf16.mxu0 (!%p465_p9), %v3421_v12  ;;  %vm523_vm4 = vcmp.le.s32.totalorder (!%p465_p9), %v522_v41, %v3831_v40  ;;  %s4387_s20 = smov (!%p465_p9), 80  }
  0x1a   : > { %s514_s18 = scalar_select %p513_p10, %s3731_s25, 1  ;;  %v3834_v43 = vsel %vm523_vm4, 0.0, %v3619_v42 }
  0x1c   : > { %s2924_s19 = sshll.u32 %s514_s18, 3  ;;  %613 = vmatpush1.bf16.msra.mxu0 %v3423_v13  ;;  %s4364_s18 = smov 80  }
  0x1d   : > { %s516_s29 = scalar_lea.vmem %s4381_s28, %s2924_s19  ;;  %614 = vmatprep.subr.bf16.mxu0 %v3424_v14  ;;  %s4368_s28 = smov 64  }
  0x1e   : > { %v3763_v0 = vld [vmem:[%s516_s29] sm:$0xff]  ;;  %s4361_s29 = smov 32  }
  0x1f   : > { %v528_v1 = vsel %vm527_vm0, %v3763_v0, 0.0 }
  0x20   : > { %529 = vadd.xlane.f32.xlu0 %v528_v1  ;;  %615 = vmatpush1.bf16.msra.mxu0 %v3426_v15 }
  0x21   : > { %3221 = vmatprep.subr.bf16.mxu0 %v3614_v26 }
  0xad   : > { %v530_v2 = vpop.xlane.xlu0 %529 }
  0xae   : > { %v532_v3 = vmul.f32 0.015625, %v530_v2 }
  0xb0   : > { %v533_v4 = vsub.f32 %v3763_v0, %v532_v3 }
  0xb2   : > { %v534_v5 = vmul.f32 %v533_v4, %v533_v4 }
  0xb4   : > { %v535_v6 = vsel %vm527_vm0, %v534_v5, 0.0 }
  0xb5   : > { %536 = vadd.xlane.f32.xlu0 %v535_v6 }
 0x142   : > { %v537_v16 = vpop.xlane.xlu0 %536 }
 0x143   : > { %v538_v17 = vmul.f32 0.015625, %v537_v16 }
 0x145   : > { %v539_v18 = vadd.f32 1e-05, %v538_v17 }
 0x147   : > { %3507 = vrsqrt.f32 %v539_v18 }
 0x151   : > { %v3508_v19 = vpop.eup %3507 }
 0x152   : > { %v541_v21 = vmul.f32 %v3508_v19, %v533_v4 }
 0x154   : > { %v548_v23 = vmul.f32 %v2925_v20, %v541_v21 }
 0x156   : > { %v555_v24 = vadd.f32 %v2926_v22, %v548_v23 }
 0x158   : > { %v556_v25 = vpack.c.bf16 %v555_v24, %v555_v24 }
 0x15a   : > { %2935 = vmatmul.mubr.msk.bf16.vlgmr.msra.gmra.mrb[0].mxu0 %vm527_vm0, %v556_v25 }
 0x15b   : > { %3223 = vmatprep.mubr.msk.bf16.mxu0 %vm3615_vm1, %v3614_v26 }
 0x22d   : > { %v642_v27 = vpop.f32.mrb[0].mxu0 }
 0x22e   : > { %v3807_v28 = vpack.c.bf16 %v642_v27, %v642_v27  ;;  %v644_v29 = vpop.f32.mrb[1].mxu0 }
 0x22f   : > { %v646_v30 = vpop.f32.mrb[2].mxu0  ;;  %v3817_v35 = vpack.c.bf16 %v644_v29, %v644_v29 }
 0x230   : > { %770 = vrot.lane.b32.xlu0 %v3807_v28, %s4369_s26  ;;  %660 = vrot.lane.b32.xlu1 %v3807_v28, %s4368_s28  ;;  %v647_v31 = vpop.f32.mrb[3].mxu0  ;;  %s4383_s28 = smov 64  }
 0x231   : > { %v726_v37 = vsel %vm724_vm3, %v3817_v35, 0 }
 0x234   : > { %772 = vrot.lane.b32.xlu1 %v3807_v28, %s4362_s23  ;;  %s4363_s23 = smov 16  }
 0x2a2   : > { %v661_v32 = vpop.permute.xlu1 %660  ;;  %v771_v38 = vpop.permute.xlu0 %770 }
 0x2a3   : > { %v667_v33 = vsel %vm662_vm2, %v661_v32, 0 }
 0x2a4   : > { %3210 = vmatpush3.bf16.xpose.msra.mxu1 %v667_v33 }
 0x2a5   : > { %3215 = vmatprep.subr.bf16.mxu1 %v3614_v26 }
 0x2a6   : > { %v773_v34 = vpop.permute.xlu1 %772 }
 0x2a7   : > { %v778_v36 = vsel %vm662_vm2, %v773_v34, 0 }
 0x2a8   : > { %3222 = vmatpush3.bf16.xpose.msra.mxu0 %v778_v36 }
 0x2a9   : > { %3233 = vmatprep.subr.bf16.mxu0 %v3614_v26 }
 0x2ab   : > { %3212 = vmatmul.mubr.msk.bf16.vlgmr.msra.gmra.mrb[0].mxu1 %vm662_vm2, %v3807_v28 }
 0x2ac   : > { %3216 = vmatpush3.bf16.msra.mxu1 %v726_v37  ;;  %3217 = vmatprep.mubr.msk.bf16.mxu1 %vm3615_vm1, %v3614_v26 }
 0x2ad   : > { %3227 = vmatprep.subr.bf16.mxu1 %v3614_v26 }
 0x2af   : > { %3224 = vmatmul.mubr.msk.bf16.vlgmr.msra.gmra.mrb[4].mxu0 %vm662_vm2, %v771_v38 }
 0x2b0   : > { %3235 = vmatprep.mubr.msk.bf16.mxu0 %vm3615_vm1, %v3614_v26  ;;  %3234 = vmatpush3.bf16.msra.mxu0 %v3428_v8 }
 0x2b1   : > { %3245 = vmatprep.subr.bf16.mxu0 %v3614_v26 }
 0x37e   : > { %v703_v44 = vpop.f32.mrb[0].mxu1 }
 0x37f   : > { %v704_v45 = vadd.f32 %v703_v44, %v3834_v43  ;;  %v3213_v46 = vpop.f32.mrb[1].mxu1 }
 0x380   : > { %v706_v47 = vpop.f32.mrb[2].mxu1 }
 0x381   : > { %v3214_v48 = vpop.f32.mrb[3].mxu1  ;;  %v710_v49 = vsel %vm709_vm5, %v704_v45, -inf }
 0x382   : > { %711 = vmax.xlane.f32.xlu1 %v710_v49  ;;  %v814_v50 = vpop.f32.mrb[4].mxu0 }
 0x383   : > { %v815_v51 = vadd.f32 %v814_v50, %v3834_v43  ;;  %v3225_v52 = vpop.f32.mrb[5].mxu0 }
 0x384   : > { %v817_v53 = vpop.f32.mrb[6].mxu0 }
 0x385   : > { %v3226_v54 = vpop.f32.mrb[7].mxu0  ;;  %v820_v55 = vsel %vm709_vm5, %v815_v51, -inf }
 0x386   : > { %821 = vmax.xlane.f32.xlu0 %v820_v55 }
 0x393   : > { %832 = vrot.lane.b32.xlu1 %v3817_v35, %s4369_s26  ;;  %s4382_s26 = smov 112  }
 0x397   : > { %982 = vrot.lane.b32.xlu1 %v3807_v28, %s4361_s29  ;;  %s4386_s29 = smov 96  }
 0x40f   : > { %v712_v56 = vpop.xlane.xlu1 %711 }
 0x410   : > { %v713_v57 = vsub.f32 %v704_v45, %v712_v56 }
 0x412   : > { %v714_v58 = vmul.f32 1.442695, %v713_v57 }
 0x413   : > { %v822_v59 = vpop.xlane.xlu0 %821  ;;  %v833_v63 = vpop.permute.xlu1 %832 }
 0x414   : > { %3509 = vpow2.f32 %v714_v58  ;;  %v823_v60 = vsub.f32 %v815_v51, %v822_v59  ;;  %v838_v3 = vsel %vm724_vm3, %v833_v63, 0  ;;  %v3429_v59 = vld [vmem:[%s4347_s4 + $0x10] sm:$0xff]  }
 0x416   : > { %v824_v61 = vmul.f32 1.442695, %v823_v60 }
 0x417   : > { %v983_v9 = vpop.permute.xlu1 %982 }
 0x418   : > { %3511 = vpow2.f32 %v824_v61  ;;  %v988_v31 = vsel %vm662_vm2, %v983_v9, 0 }
 0x41e   : > { %v3510_v62 = vpop.eup %3509 }
 0x41f   : > { %v716_v1 = vsel %vm709_vm5, %v3510_v62, 0.0  ;;  %v720_v2 = vpack.c.bf16 %v3510_v62, %v3510_v62 }
 0x420   : > { %717 = vadd.xlane.f32.xlu1 %v716_v1 }
 0x421   : > { %3218 = vmatmul.mubr.msk.bf16.vlgmr.msra.gmra.mrb[4].mxu1 %vm709_vm5, %v720_v2 }
 0x422   : > { %v3512_v4 = vpop.eup %3511  ;;  %3228 = vmatpush3.bf16.msra.mxu1 %v838_v3  ;;  %3229 = vmatprep.mubr.msk.bf16.mxu1 %vm3615_vm1, %v3614_v26 }
 0x423   : > { %v826_v5 = vsel %vm709_vm5, %v3512_v4, 0.0  ;;  %3239 = vmatprep.subr.bf16.mxu1 %v3614_v26  ;;  %v830_v6 = vpack.c.bf16 %v3512_v4, %v3512_v4 }
 0x424   : > { %827 = vadd.xlane.f32.xlu0 %v826_v5 }
 0x429   : > { %3230 = vmatmul.mubr.msk.bf16.vlgmr.msra.gmra.mrb[8].mxu1 %vm709_vm5, %v830_v6 }
 0x42a   : > { %3241 = vmatprep.mubr.msk.bf16.mxu1 %vm3615_vm1, %v3614_v26  ;;  %3240 = vmatpush3.bf16.msra.mxu1 %v3427_v7 }
 0x42b   : > { %3251 = vmatprep.subr.bf16.mxu1 %v3614_v26 }
 0x431   : > { %1041 = vrot.lane.b32.xlu1 %v3817_v35, %s4366_s30 }
 0x435   : > { %1141 = vrot.lane.b32.xlu1 %v3807_v28, %s4364_s18 }
 0x43a   : > { %980 = vrot.lane.b32.xlu0 %v3807_v28, %s4366_s30 }
 0x4ad   : > { %v718_v10 = vpop.xlane.xlu1 %717 }
 0x4ae   : > { %3513 = vrcp.f32 %v718_v10 }
 0x4b1   : > { %v828_v12 = vpop.xlane.xlu0 %827  ;;  %v1042_v17 = vpop.permute.xlu1 %1041 }
 0x4b2   : > { %3515 = vrcp.f32 %v828_v12  ;;  %v1047_v21 = vsel %vm724_vm3, %v1042_v17, 0 }
 0x4b5   : > { %v981_v32 = vpop.permute.xlu0 %980 }
 0x4b8   : > { %v3514_v13 = vpop.eup %3513 }
 0x4bc   : > { %v3516_v22 = vpop.eup %3515 }
 0x4f4   : > { %v762_v14 = vpop.f32.mrb[4].mxu1 }
 0x4f5   : > { %v768_v15 = vmul.f32 %v3514_v13, %v762_v14  ;;  %v3219_v16 = vpop.f32.mrb[5].mxu1 }
 0x4f6   : > { %v765_v18 = vpop.f32.mrb[6].mxu1 }
 0x4f7   : > { %v769_v19 = vpack.c.bf16 %v768_v15, %v768_v15  ;;  %v3220_v20 = vpop.f32.mrb[7].mxu1 }
 0x4f9   : > { %3242 = vmatmul.mubr.msk.bf16.vlgmr.msra.gmra.mrb[12].mxu1 %vm662_vm2, %v769_v19  ;;  %v3430_v19 = vld [vmem:[%s4347_s4 + $0x18] sm:$0xff]  }
 0x4fa   : > { %3252 = vmatpush3.bf16.msra.mxu1 %v1047_v21  ;;  %3253 = vmatprep.mubr.msk.bf16.mxu1 %vm3615_vm1, %v3614_v26 }
 0x4fb   : > { %3263 = vmatprep.subr.bf16.mxu1 %v3614_v26 }
 0x4fc   : > { %v874_v23 = vpop.f32.mrb[8].mxu1 }
 0x4fd   : > { %v880_v24 = vmul.f32 %v3516_v22, %v874_v23  ;;  %v3231_v25 = vpop.f32.mrb[9].mxu1 }
 0x4fe   : > { %v877_v27 = vpop.f32.mrb[10].mxu1 }
 0x4ff   : > { %v881_v29 = vpack.c.bf16 %v880_v24, %v880_v24  ;;  %v3232_v30 = vpop.f32.mrb[11].mxu1 }
 0x501   : > { %3236 = vmatmul.mubr.msk.bf16.vlgmr.msra.gmra.mrb[8].mxu0 %vm662_vm2, %v881_v29 }
 0x502   : > { %3246 = vmatpush3.bf16.xpose.msra.mxu0 %v988_v31  ;;  %3247 = vmatprep.mubr.msk.bf16.mxu0 %vm3615_vm1, %v3614_v26 }
 0x503   : > { %3257 = vmatprep.subr.bf16.mxu0 %v3614_v26 }
 0x509   : > { %3248 = vmatmul.mubr.msk.bf16.vlgmr.msra.gmra.mrb[12].mxu0 %vm662_vm2, %v981_v32 }
 0x50a   : > { %3259 = vmatprep.mubr.msk.bf16.mxu0 %vm3615_vm1, %v3614_v26  ;;  %3258 = vmatpush3.bf16.msra.mxu0 %v3429_v59  ;;  %v3444_v59 = vld [vmem:[%s4353_s10] sm:$0xff]  }
 0x50b   : > { %3269 = vmatprep.subr.bf16.mxu0 %v3614_v26 }
 0x5cc   : > { %v974_v33 = vpop.f32.mrb[12].mxu1 }
 0x5cd   : > { %v3243_v34 = vpop.f32.mrb[13].mxu1 }
 0x5ce   : > { %v977_v36 = vpop.f32.mrb[14].mxu1 }
 0x5cf   : > { %v3244_v37 = vpop.f32.mrb[15].mxu1 }
 0x5d4   : > { %v925_v38 = vpop.f32.mrb[8].mxu0 }
 0x5d5   : > { %v3881_v39 = vadd.f32 %v974_v33, %v925_v38  ;;  %v3237_v41 = vpop.f32.mrb[9].mxu0 }
 0x5d6   : > { %v928_v42 = vpop.f32.mrb[10].mxu0 }
 0x5d7   : > { %v3238_v44 = vpop.f32.mrb[11].mxu0 }
 0x5dc   : > { %v1024_v45 = vpop.f32.mrb[12].mxu0 }
 0x5dd   : > { %v1025_v46 = vadd.f32 %v1024_v45, %v3834_v43  ;;  %v3249_v47 = vpop.f32.mrb[13].mxu0 }
 0x5de   : > { %v1027_v48 = vpop.f32.mrb[14].mxu0 }
 0x5df   : > { %v3250_v49 = vpop.f32.mrb[15].mxu0  ;;  %v1030_v50 = vsel %vm709_vm5, %v1025_v46, -inf }
 0x5e0   : > { %1031 = vmax.xlane.f32.xlu0 %v1030_v50 }
 0x5f6   : > { %1143 = vrot.lane.b32.xlu0 %v3807_v28, %s4363_s23  ;;  %v1142_v28 = vpop.permute.xlu1 %1141 }
 0x66d   : > { %v1032_v51 = vpop.xlane.xlu0 %1031 }
 0x66e   : > { %v1033_v52 = vsub.f32 %v1025_v46, %v1032_v51 }
 0x670   : > { %v1034_v53 = vmul.f32 1.442695, %v1033_v52  ;;  %v3433_v52 = vld [vmem:[%s4351_s8 + $0x4] ss:$8 sps:$4 sm:$0xff]  }
 0x671   : > { %v1144_v55 = vpop.permute.xlu0 %1143 }
 0x672   : > { %3517 = vpow2.f32 %v1034_v53  ;;  %v1149_v58 = vsel %vm662_vm2, %v1144_v55, 0  ;;  %v3436_v53 = vld [vmem:[%s4351_s8 + $0x14] ss:$8 sps:$4 sm:$0xff]   ;;  %v3439_v55 = vld [vmem:[%s4351_s8 + $0x24] ss:$8 sps:$4 sm:$0xff]  }
 0x67c   : > { %v3518_v54 = vpop.eup %3517 }
 0x67d   : > { %v1036_v56 = vsel %vm709_vm5, %v3518_v54, 0.0  ;;  %v1040_v57 = vpack.c.bf16 %v3518_v54, %v3518_v54  ;;  %v3434_v54 = vld [vmem:[%s4351_s8 + $0x10] ss:$8 sps:$4 sm:$0xff]  }
 0x67e   : > { %1037 = vadd.xlane.f32.xlu1 %v1036_v56  ;;  %v3437_v56 = vld [vmem:[%s4351_s8 + $0x20] ss:$8 sps:$4 sm:$0xff]  }
 0x67f   : > { %3254 = vmatmul.mubr.msk.bf16.vlgmr.msra.gmra.mrb[16].mxu1 %vm709_vm5, %v1040_v57  ;;  %v3442_v57 = vld [vmem:[%s4351_s8 + $0x34] ss:$8 sps:$4 sm:$0xff]  }
 0x680   : > { %3264 = vmatpush3.bf16.xpose.msra.mxu1 %v1149_v58  ;;  %3265 = vmatprep.mubr.msk.bf16.mxu1 %vm3615_vm1, %v3614_v26  ;;  %v3440_v58 = vld [vmem:[%s4351_s8 + $0x30] ss:$8 sps:$4 sm:$0xff]  }
 0x681   : > { %3275 = vmatprep.subr.bf16.mxu1 %v3614_v26 }
 0x687   : > { %3266 = vmatmul.mubr.msk.bf16.vlgmr.msra.gmra.mrb[20].mxu1 %vm662_vm2, %v1142_v28  ;;  %v3443_v28 = vld [vmem:[%s4353_s10 + $0x40] sm:$0xff]  }
 0x688   : > { %3277 = vmatprep.mubr.msk.bf16.mxu1 %vm3615_vm1, %v3614_v26  ;;  %3276 = vmatpush3.bf16.msra.mxu1 %v3430_v19  ;;  %v3457_v19 = vld [vmem:[%s4353_s10 + $0x78] sm:$0xff]  }
 0x689   : > { %3136 = vmatprep.subr.bf16.mxu1 %v3443_v28  ;;  %v3465_v28 = vld [vmem:[%s4346_s3 + $0x60] ss:$8 sps:$4 sm:$0xff]  }
 0x68f   : > { %1202 = vrot.lane.b32.xlu1 %v3817_v35, %s4364_s18  ;;  %s3109_s18 = sshll.u32 %s3731_s25, 7 }
 0x70b   : > { %v1038_v60 = vpop.xlane.xlu1 %1037 }
 0x70c   : > { %3519 = vrcp.f32 %v1038_v60  ;;  %v3445_v60 = vld [vmem:[%s4353_s10 + $0x48] sm:$0xff]  }
 0x70f   : > { %v1203_v2 = vpop.permute.xlu1 %1202 }
 0x710   : > { %v1208_v6 = vsel %vm724_vm3, %v1203_v2, 0  ;;  %v3450_v2 = vld [vmem:[%s4353_s10 + $0x18] sm:$0xff]  }
 0x716   : > { %v3520_v61 = vpop.eup %3519 }
 0x752   : > { %v1083_v62 = vpop.f32.mrb[16].mxu1 }
 0x753   : > { %v1089_v63 = vmul.f32 %v3520_v61, %v1083_v62  ;;  %v3255_v1 = vpop.f32.mrb[17].mxu1  ;;  %v3446_v61 = vld [vmem:[%s4353_s10 + $0x8] sm:$0xff]   ;;  %v3447_v62 = vld [vmem:[%s4353_s10 + $0x50] sm:$0xff]  }
 0x754   : > { %v1086_v3 = vpop.f32.mrb[18].mxu1  ;;  %v3449_v1 = vld [vmem:[%s4353_s10 + $0x58] sm:$0xff]  }
 0x755   : > { %v1090_v4 = vpack.c.bf16 %v1089_v63, %v1089_v63  ;;  %v3256_v5 = vpop.f32.mrb[19].mxu1  ;;  %v3448_v63 = vld [vmem:[%s4353_s10 + $0x10] sm:$0xff]   ;;  %v3451_v3 = vld [vmem:[%s4353_s10 + $0x60] sm:$0xff]  }
 0x756   : > { %v3453_v5 = vld [vmem:[%s4353_s10 + $0x68] sm:$0xff]  }
 0x757   : > { %3260 = vmatmul.mubr.msk.bf16.vlgmr.msra.gmra.mrb[16].mxu0 %vm662_vm2, %v1090_v4  ;;  %v3452_v4 = vld [vmem:[%s4353_s10 + $0x20] sm:$0xff]  }
 0x758   : > { %3270 = vmatpush3.bf16.msra.mxu0 %v1208_v6  ;;  %3271 = vmatprep.mubr.msk.bf16.mxu0 %vm3615_vm1, %v3614_v26  ;;  %v3454_v6 = vld [vmem:[%s4353_s10 + $0x28] sm:$0xff]  }
 0x759   : > { %1404 = vmatprep.subr.bf16.mxu0 %v3433_v52 }
 0x75a   : > { %v1185_v35 = vpop.f32.mrb[20].mxu1 }
 0x75b   : > { %v1186_v7 = vadd.f32 %v1185_v35, %v3834_v43  ;;  %v3267_v8 = vpop.f32.mrb[21].mxu1 }
 0x75c   : > { %v1188_v9 = vpop.f32.mrb[22].mxu1 }
 0x75d   : > { %v3268_v10 = vpop.f32.mrb[23].mxu1  ;;  %v1191_v12 = vsel %vm709_vm5, %v1186_v7, -inf }
 0x75e   : > { %1192 = vmax.xlane.f32.xlu0 %v1191_v12  ;;  %v2953_v10 = vld [vmem:[%s4349_s6] ss:$0 sm:$0xff] }
 0x7eb   : > { %v1193_v13 = vpop.xlane.xlu0 %1192 }
 0x7ec   : > { %v1194_v14 = vsub.f32 %v1186_v7, %v1193_v13  ;;  %v2954_v13 = vld [vmem:[%s4350_s7] ss:$0 sm:$0xff] }
 0x7ee   : > { %v1195_v15 = vmul.f32 1.442695, %v1194_v14 }
 0x7f0   : > { %3521 = vpow2.f32 %v1195_v15 }
 0x7fa   : > { %v3522_v16 = vpop.eup %3521 }
 0x7fb   : > { %v1197_v17 = vsel %vm709_vm5, %v3522_v16, 0.0  ;;  %v1201_v18 = vpack.c.bf16 %v3522_v16, %v3522_v16 }
 0x7fc   : > { %1198 = vadd.xlane.f32.xlu0 %v1197_v17  ;;  %v3455_v17 = vld [vmem:[%s4353_s10 + $0x70] sm:$0xff]  }
 0x7fd   : > { %3272 = vmatmul.mubr.msk.bf16.vlgmr.msra.gmra.mrb[20].mxu0 %vm709_vm5, %v1201_v18  ;;  %v3456_v18 = vld [vmem:[%s4353_s10 + $0x30] sm:$0xff]  }
 0x7fe   : > { %1436 = vmatprep.mubr.bf16.mxu0 %v3613_v11 }
 0x82a   : > { %v1134_v20 = vpop.f32.mrb[16].mxu0 }
 0x82b   : > { %v1140_v21 = vadd.f32 %v1134_v20, %v3881_v39  ;;  %v3261_v22 = vpop.f32.mrb[17].mxu0  ;;  %v2952_v39 = vld [vmem:[%s4348_s5] ss:$0 sm:$0xff]  ;;  %v3458_v20 = vld [vmem:[%s4353_s10 + $0x38] sm:$0xff]  }
 0x82c   : > { %v1137_v23 = vpop.f32.mrb[18].mxu0  ;;  %v1349_v22 = vld [vmem:[%s4352_s9] sm:$0x3] }
 0x82d   : > { %v3262_v24 = vpop.f32.mrb[19].mxu0  ;;  %v1357_v23 = vsub.s32 1, %v3831_v40 }
 0x889   : > { %v1199_v25 = vpop.xlane.xlu0 %1198 }
 0x88a   : > { %3523 = vrcp.f32 %v1199_v25  ;;  %v1358_v25 = vrot.slane %v1349_v22, %v1357_v23 }
 0x894   : > { %v3524_v27 = vpop.eup %3523 }
 0x8d0   : > { %v1244_v29 = vpop.f32.mrb[20].mxu0 }
 0x8d1   : > { %v1250_v30 = vmul.f32 %v3524_v27, %v1244_v29  ;;  %v3273_v31 = vpop.f32.mrb[21].mxu0 }
 0x8d2   : > { %v1247_v32 = vpop.f32.mrb[22].mxu0 }
 0x8d3   : > { %v1251_v33 = vpack.c.bf16 %v1250_v30, %v1250_v30  ;;  %v3274_v34 = vpop.f32.mrb[23].mxu0 }
 0x8d5   : > { %3278 = vmatmul.mubr.msk.bf16.vlgmr.msra.gmra.mrb[24].mxu1 %vm662_vm2, %v1251_v33 }
 0x8d6   : > { %3137 = vmatpush3.bf16.msra.mxu1 %v3444_v59  ;;  %v3470_v59 = vld [vmem:[%s4346_s3 + $0x74] ss:$8 sps:$4 sm:$0xff]  }
 0x8d7   : > { %3138 = vmatprep.subr.bf16.mxu1 %v3445_v60  ;;  %v3468_v60 = vld [vmem:[%s4346_s3 + $0x70] ss:$8 sps:$4 sm:$0xff]  }
 0x8da   : > { %3139 = vmatpush3.bf16.msra.mxu1 %v3446_v61 }
 0x8db   : > { %3140 = vmatprep.subr.bf16.mxu1 %v3447_v62 }
 0x8de   : > { %3141 = vmatpush3.bf16.msra.mxu1 %v3448_v63 }
 0x8df   : > { %3142 = vmatprep.subr.bf16.mxu1 %v3449_v1 }
 0x8e2   : > { %3143 = vmatpush3.bf16.msra.mxu1 %v3450_v2  ;;  %v2983_v2 = vld [vmem:[%s4344_s1 + $0x1] ss:$0 sm:$0xff] }
 0x8e3   : > { %3144 = vmatprep.subr.bf16.mxu1 %v3451_v3 }
 0x8e6   : > { %3145 = vmatpush3.bf16.msra.mxu1 %v3452_v4  ;;  %v2984_v4 = vld [vmem:[%s4345_s2 + $0x1] ss:$0 sm:$0xff] }
 0x8e7   : > { %3146 = vmatprep.subr.bf16.mxu1 %v3453_v5 }
 0x8ea   : > { %3147 = vmatpush3.bf16.msra.mxu1 %v3454_v6 }
 0x8eb   : > { %3148 = vmatprep.subr.bf16.mxu1 %v3455_v17 }
 0x8ee   : > { %3149 = vmatpush3.bf16.msra.mxu1 %v3456_v18 }
 0x8ef   : > { %3150 = vmatprep.subr.bf16.mxu1 %v3457_v19 }
 0x8f2   : > { %3151 = vmatpush3.bf16.msra.mxu1 %v3458_v20 }
 0x8f3   : > { %3287 = vmatprep.subr.bf16.mxu1 %v3614_v26 }
 0x9a8   : > { %v1295_v36 = vpop.f32.mrb[24].mxu1 }
 0x9a9   : > { %v1301_v37 = vadd.f32 %v1295_v36, %v1140_v21  ;;  %v3279_v38 = vpop.f32.mrb[25].mxu1  ;;  %v1353_v21 = vsub.s32 0, %v3831_v40  ;;  %v3099_v40 = vld [vmem:[%s4354_s11 + $0x1] ss:$0 sm:$0xff] }
 0x9aa   : > { %v1298_v41 = vpop.f32.mrb[26].mxu1 }
 0x9ab   : > { %v1302_v42 = vadd.f32 %v1301_v37, %v3763_v0  ;;  %v3280_v44 = vpop.f32.mrb[27].mxu1  ;;  %v3431_v0 = vld [vmem:[%s4351_s8] ss:$8 sps:$4 sm:$0xff]   ;;  %v1354_v24 = vrot.slane %v1349_v22, %v1353_v21 }
 0x9ac   : > { %1405 = vmatpush1.bf16.msra.mxu0 %v3431_v0 }
 0x9ad   : > { %v3920_v45 = vadd.f32 %v2952_v39, %v1302_v42  ;;  %1406 = vmatprep.subr.bf16.mxu0 %v3436_v53 }
 0x9af   : > { %v1313_v46 = vsel %vm527_vm0, %v3920_v45, 0.0 }
 0x9b0   : > { %1314 = vadd.xlane.f32.xlu0 %v1313_v46  ;;  %1407 = vmatpush1.bf16.msra.mxu0 %v3434_v54  ;;  %v2980_v46 = vld [vmem:[%s4354_s11] ss:$0 sm:$0xff] }
 0x9b1   : > { %1408 = vmatprep.subr.bf16.mxu0 %v3439_v55  ;;  %v3461_v55 = vld [vmem:[%s4346_s3 + $0x44] ss:$8 sps:$4 sm:$0xff]  }
 0x9b4   : > { %1409 = vmatpush1.bf16.msra.mxu0 %v3437_v56  ;;  %v3464_v56 = vld [vmem:[%s4346_s3 + $0x54] ss:$8 sps:$4 sm:$0xff]  }
 0x9b5   : > { %1410 = vmatprep.subr.bf16.mxu0 %v3442_v57  ;;  %v3462_v57 = vld [vmem:[%s4346_s3 + $0x50] ss:$8 sps:$4 sm:$0xff]  }
 0x9b8   : > { %1411 = vmatpush1.bf16.msra.mxu0 %v3440_v58  ;;  %v3467_v58 = vld [vmem:[%s4346_s3 + $0x64] ss:$8 sps:$4 sm:$0xff]  }
 0x9b9   : > { %1710 = vmatprep.subr.bf16.mxu0 %v3461_v55  ;;  %v3472_v55 = vld [vmem:[%s4347_s4 + $0x28] sm:$0xff]  }
 0xa3d   : > { %v1315_v47 = vpop.xlane.xlu0 %1314 }
 0xa3e   : > { %v1316_v48 = vmul.f32 0.015625, %v1315_v47 }
 0xa40   : > { %v1317_v49 = vsub.f32 %v3920_v45, %v1316_v48 }
 0xa42   : > { %v1318_v50 = vmul.f32 %v1317_v49, %v1317_v49 }
 0xa44   : > { %v1319_v51 = vsel %vm527_vm0, %v1318_v50, 0.0 }
 0xa45   : > { %1320 = vadd.xlane.f32.xlu1 %v1319_v51 }
 0xad2   : > { %v1321_v35 = vpop.xlane.xlu1 %1320 }
 0xad3   : > { %v1322_v7 = vmul.f32 0.015625, %v1321_v35 }
 0xad5   : > { %v1323_v8 = vadd.f32 1e-05, %v1322_v7 }
 0xad7   : > { %3525 = vrsqrt.f32 %v1323_v8 }
 0xae1   : > { %v3526_v9 = vpop.eup %3525 }
 0xae2   : > { %v1325_v12 = vmul.f32 %v3526_v9, %v1317_v49 }
 0xae4   : > { %v1332_v14 = vmul.f32 %v2953_v10, %v1325_v12 }
 0xae6   : > { %v1339_v15 = vadd.f32 %v2954_v13, %v1332_v14 }
 0xae8   : > { %v1340_v16 = vpack.c.bf16 %v1339_v15, %v1339_v15 }
 0xaea   : > { %2963 = vmatmul.mubr.msk.bf16.vlgmr.msra.gmra.mrb[24].mxu0 %vm527_vm0, %v1340_v16 }
 0xaeb   : > { %1742 = vmatprep.mubr.bf16.mxu0 %v3613_v11 }
 0xbbd   : > { %v1438_v27 = vpop.f32.mrb[24].mxu0 }
 0xbbe   : > { %v1439_v29 = vadd.f32 %v1438_v27, %v1354_v24  ;;  %v1440_v30 = vpop.f32.mrb[25].mxu0 }
 0xbbf   : > { %v1441_v31 = vadd.f32 %v1440_v30, %v1358_v25  ;;  %v1442_v32 = vpop.f32.mrb[26].mxu0 }
 0xbc0   : > { %v1445_v33 = vmax.f32 %v1439_v29, 0.0  ;;  %v1443_v34 = vpop.f32.mrb[27].mxu0 }
 0xbc1   : > { %v1446_v36 = vmax.f32 %v1441_v31, 0.0 }
 0xbc2   : > { %v1447_v38 = vpack.c.bf16 %v1445_v33, %v1445_v33 }
 0xbc3   : > { %v1448_v37 = vpack.c.bf16 %v1446_v36, %v1446_v36 }
 0xbc5   : > { %1609 = vmatprep.mubr.bf16.mxu1 %v1448_v37 }
 0xbc6   : > { %1610 = vmatmul.mubr.bf16.vlgmr.msra.gmra.mrb[28].mxu1 %v1447_v38 }
 0xbc7   : > { %3289 = vmatprep.mubr.msk.bf16.mxu1 %vm3615_vm1, %v3614_v26 }
 0xc99   : > { %v3152_v39 = vpop.f32.mrb[28].mxu1 }
 0xc9a   : > { %v3153_v41 = vpop.f32.mrb[29].mxu1 }
 0xc9b   : > { %v3154_v42 = vadd.f32 %v3153_v41, %v3152_v39  ;;  %v3155_v44 = vpop.f32.mrb[30].mxu1 }
 0xc9c   : > { %v3156_v47 = vpop.f32.mrb[31].mxu1 }
 0xc9d   : > { %v1617_v48 = vadd.f32 %v3154_v42, %v3920_v45  ;;  %v3459_v45 = vld [vmem:[%s4346_s3 + $0x40] ss:$8 sps:$4 sm:$0xff]  }
 0xc9e   : > { %1711 = vmatpush1.bf16.msra.mxu0 %v3459_v45 }
 0xc9f   : > { %v4022_v49 = vadd.f32 %v2980_v46, %v1617_v48  ;;  %1712 = vmatprep.subr.bf16.mxu0 %v3464_v56 }
 0xca1   : > { %v1630_v50 = vsel %vm527_vm0, %v4022_v49, 0.0 }
 0xca2   : > { %1631 = vadd.xlane.f32.xlu0 %v1630_v50  ;;  %1713 = vmatpush1.bf16.msra.mxu0 %v3462_v57 }
 0xca3   : > { %1714 = vmatprep.subr.bf16.mxu0 %v3467_v58 }
 0xca6   : > { %1715 = vmatpush1.bf16.msra.mxu0 %v3465_v28 }
 0xca7   : > { %1716 = vmatprep.subr.bf16.mxu0 %v3470_v59 }
 0xcaa   : > { %1717 = vmatpush1.bf16.msra.mxu0 %v3468_v60 }
 0xcab   : > { %3281 = vmatprep.subr.bf16.mxu0 %v3614_v26 }
 0xd2f   : > { %v1632_v51 = vpop.xlane.xlu0 %1631 }
 0xd30   : > { %v1633_v52 = vmul.f32 0.015625, %v1632_v51 }
 0xd32   : > { %v1634_v0 = vsub.f32 %v4022_v49, %v1633_v52 }
 0xd34   : > { %v1635_v53 = vmul.f32 %v1634_v0, %v1634_v0 }
 0xd36   : > { %v1636_v54 = vsel %vm527_vm0, %v1635_v53, 0.0 }
 0xd37   : > { %1637 = vadd.xlane.f32.xlu0 %v1636_v54  ;;  %v3471_v54 = vld [vmem:[%s4347_s4 + $0x20] sm:$0xff]  }
 0xdc4   : > { %v1638_v61 = vpop.xlane.xlu0 %1637 }
 0xdc5   : > { %v1639_v62 = vmul.f32 0.015625, %v1638_v61 }
 0xdc7   : > { %v1640_v63 = vadd.f32 1e-05, %v1639_v62 }
 0xdc9   : > { %3527 = vrsqrt.f32 %v1640_v63 }
 0xdd3   : > { %v3528_v1 = vpop.eup %3527 }
 0xdd4   : > { %v1642_v3 = vmul.f32 %v3528_v1, %v1634_v0 }
 0xdd6   : > { %v1649_v5 = vmul.f32 %v2983_v2, %v1642_v3 }
 0xdd8   : > { %v1656_v6 = vadd.f32 %v2984_v4, %v1649_v5 }
 0xdda   : > { %v1657_v35 = vpack.c.bf16 %v1656_v6, %v1656_v6 }
 0xddc   : > { %3001 = vmatmul.mubr.msk.bf16.vlgmr.msra.gmra.mrb[28].mxu0 %vm527_vm0, %v1657_v35 }
 0xddd   : > { %3283 = vmatprep.mubr.msk.bf16.mxu0 %vm3615_vm1, %v3614_v26 }
 0xeaf   : > { %v1744_v7 = vpop.f32.mrb[28].mxu0 }
 0xeb0   : > { %v4062_v8 = vpack.c.bf16 %v1744_v7, %v1744_v7  ;;  %v1746_v9 = vpop.f32.mrb[29].mxu0 }
 0xeb1   : > { %v4064_v10 = vpack.c.bf16 %v1746_v9, %v1746_v9  ;;  %v1748_v12 = vpop.f32.mrb[30].mxu0 }
 0xeb2   : > { %1870 = vrot.lane.b32.xlu1 %v4062_v8, %s4382_s26  ;;  %1763 = vrot.lane.b32.xlu0 %v4062_v8, %s4383_s28  ;;  %v1749_v13 = vpop.f32.mrb[31].mxu0 }
 0xeb3   : > { %v1826_v14 = vsel %vm724_vm3, %v4064_v10, 0 }
 0xeb4   : > { %3288 = vmatpush3.bf16.msra.mxu1 %v1826_v14 }
 0xeb5   : > { %3299 = vmatprep.subr.bf16.mxu1 %v3614_v26 }
 0xeb6   : > { %1872 = vrot.lane.b32.xlu0 %v4062_v8, %s4384_s27 }
 0xf24   : > { %v1764_v15 = vpop.permute.xlu0 %1763  ;;  %v1871_v19 = vpop.permute.xlu1 %1870 }
 0xf25   : > { %v1769_v16 = vsel %vm662_vm2, %v1764_v15, 0 }
 0xf26   : > { %3282 = vmatpush3.bf16.xpose.msra.mxu0 %v1769_v16 }
 0xf27   : > { %3293 = vmatprep.subr.bf16.mxu0 %v3614_v26 }
 0xf28   : > { %v1873_v17 = vpop.permute.xlu0 %1872 }
 0xf29   : > { %v1878_v18 = vsel %vm662_vm2, %v1873_v17, 0 }
 0xf2d   : > { %3284 = vmatmul.mubr.msk.bf16.vlgmr.msra.gmra.mrb[32].mxu0 %vm662_vm2, %v4062_v8 }
 0xf2e   : > { %3294 = vmatpush3.bf16.xpose.msra.mxu0 %v1878_v18  ;;  %3295 = vmatprep.mubr.msk.bf16.mxu0 %vm3615_vm1, %v3614_v26 }
 0xf2f   : > { %3305 = vmatprep.subr.bf16.mxu0 %v3614_v26 }
 0xf35   : > { %3296 = vmatmul.mubr.msk.bf16.vlgmr.msra.gmra.mrb[36].mxu0 %vm662_vm2, %v1871_v19 }
 0xf36   : > { %3307 = vmatprep.mubr.msk.bf16.mxu0 %vm3615_vm1, %v3614_v26  ;;  %3306 = vmatpush3.bf16.msra.mxu0 %v3472_v55 }
 0xf37   : > { %3317 = vmatprep.subr.bf16.mxu0 %v3614_v26 }
0x1000   : > { %v1805_v20 = vpop.f32.mrb[32].mxu0 }
0x1001   : > { %v1806_v22 = vadd.f32 %v1805_v20, %v3834_v43  ;;  %v3285_v24 = vpop.f32.mrb[33].mxu0 }
0x1002   : > { %v1808_v25 = vpop.f32.mrb[34].mxu0 }
0x1003   : > { %v3286_v27 = vpop.f32.mrb[35].mxu0  ;;  %v1811_v29 = vsel %vm709_vm5, %v1806_v22, -inf }
0x1004   : > { %1812 = vmax.xlane.f32.xlu0 %v1811_v29 }
0x1008   : > { %v1914_v30 = vpop.f32.mrb[36].mxu0 }
0x1009   : > { %v1915_v31 = vadd.f32 %v1914_v30, %v3834_v43  ;;  %v3297_v32 = vpop.f32.mrb[37].mxu0 }
0x100a   : > { %v1917_v33 = vpop.f32.mrb[38].mxu0 }
0x100b   : > { %v3298_v34 = vpop.f32.mrb[39].mxu0  ;;  %v1920_v36 = vsel %vm709_vm5, %v1915_v31, -inf }
0x100c   : > { %1921 = vmax.xlane.f32.xlu1 %v1920_v36 }
0x101a   : > { %1932 = vrot.lane.b32.xlu0 %v4064_v10, %s4382_s26  ;;  %s4388_s26 = smov 16  }
0x101e   : > { %2082 = vrot.lane.b32.xlu0 %v4062_v8, %s4385_s17 }
0x1091   : > { %v1813_v37 = vpop.xlane.xlu0 %1812 }
0x1092   : > { %v1814_v38 = vsub.f32 %v1806_v22, %v1813_v37 }
0x1094   : > { %v1815_v39 = vmul.f32 1.442695, %v1814_v38 }
0x1095   : > { %v1933_v47 = vpop.permute.xlu0 %1932 }
0x1096   : > { %3529 = vpow2.f32 %v1815_v39  ;;  %v1938_v51 = vsel %vm724_vm3, %v1933_v47, 0 }
0x1099   : > { %v1922_v41 = vpop.xlane.xlu1 %1921  ;;  %v2083_v45 = vpop.permute.xlu0 %2082 }
0x109a   : > { %v1923_v42 = vsub.f32 %v1915_v31, %v1922_v41  ;;  %v2088_v12 = vsel %vm662_vm2, %v2083_v45, 0 }
0x109c   : > { %v1924_v44 = vmul.f32 1.442695, %v1923_v42 }
0x109e   : > { %3531 = vpow2.f32 %v1924_v44  ;;  %v3473_v44 = vld [vmem:[%s4347_s4 + $0x30] sm:$0xff]  }
0x10a0   : > { %v3530_v46 = vpop.eup %3529 }
0x10a1   : > { %v1817_v48 = vsel %vm709_vm5, %v3530_v46, 0.0  ;;  %v1821_v50 = vpack.c.bf16 %v3530_v46, %v3530_v46 }
0x10a2   : > { %1818 = vadd.xlane.f32.xlu0 %v1817_v48 }
0x10a3   : > { %3290 = vmatmul.mubr.msk.bf16.vlgmr.msra.gmra.mrb[32].mxu1 %vm709_vm5, %v1821_v50 }
0x10a4   : > { %3300 = vmatpush3.bf16.msra.mxu1 %v1938_v51  ;;  %3301 = vmatprep.mubr.msk.bf16.mxu1 %vm3615_vm1, %v3614_v26 }
0x10a5   : > { %3311 = vmatprep.subr.bf16.mxu1 %v3614_v26 }
0x10a8   : > { %v3532_v52 = vpop.eup %3531 }
0x10a9   : > { %v1926_v0 = vsel %vm709_vm5, %v3532_v52, 0.0  ;;  %v1930_v53 = vpack.c.bf16 %v3532_v52, %v3532_v52 }
0x10aa   : > { %1927 = vadd.xlane.f32.xlu1 %v1926_v0 }
0x10ab   : > { %3302 = vmatmul.mubr.msk.bf16.vlgmr.msra.gmra.mrb[36].mxu1 %vm709_vm5, %v1930_v53 }
0x10ac   : > { %3313 = vmatprep.mubr.msk.bf16.mxu1 %vm3615_vm1, %v3614_v26  ;;  %3312 = vmatpush3.bf16.msra.mxu1 %v3471_v54 }
0x10ad   : > { %3323 = vmatprep.subr.bf16.mxu1 %v3614_v26 }
0x10b8   : > { %2141 = vrot.lane.b32.xlu0 %v4064_v10, %s4386_s29 }
0x10bb   : > { %2080 = vrot.lane.b32.xlu1 %v4062_v8, %s4386_s29  ;;  %s4301_s29 = scalar_lea.hbm %s4359_s16, %s3109_s18 }
0x10bc   : > { %2241 = vrot.lane.b32.xlu0 %v4062_v8, %s4387_s20 }
0x112f   : > { %v1819_v56 = vpop.xlane.xlu0 %1818 }
0x1130   : > { %3533 = vrcp.f32 %v1819_v56 }
0x1133   : > { %v2142_v61 = vpop.permute.xlu0 %2141 }
0x1134   : > { %v2147_v2 = vsel %vm724_vm3, %v2142_v61, 0 }
0x1137   : > { %v1928_v57 = vpop.xlane.xlu1 %1927 }
0x1138   : > { %3535 = vrcp.f32 %v1928_v57 }
0x113a   : > { %v3534_v58 = vpop.eup %3533 }
0x113b   : > { %v2081_v13 = vpop.permute.xlu1 %2080 }
0x1142   : > { %v3536_v3 = vpop.eup %3535 }
0x1176   : > { %v1862_v28 = vpop.f32.mrb[32].mxu1 }
0x1177   : > { %v1868_v59 = vmul.f32 %v3534_v58, %v1862_v28  ;;  %v3291_v60 = vpop.f32.mrb[33].mxu1 }
0x1178   : > { %v1865_v62 = vpop.f32.mrb[34].mxu1 }
0x1179   : > { %v1869_v63 = vpack.c.bf16 %v1868_v59, %v1868_v59  ;;  %v3292_v1 = vpop.f32.mrb[35].mxu1 }
0x117b   : > { %3314 = vmatmul.mubr.msk.bf16.vlgmr.msra.gmra.mrb[40].mxu1 %vm662_vm2, %v1869_v63 }
0x117c   : > { %3324 = vmatpush3.bf16.msra.mxu1 %v2147_v2  ;;  %3325 = vmatprep.mubr.msk.bf16.mxu1 %vm3615_vm1, %v3614_v26 }
0x117d   : > { %3335 = vmatprep.subr.bf16.mxu1 %v3614_v26 }
0x117e   : > { %v1974_v4 = vpop.f32.mrb[36].mxu1 }
0x117f   : > { %v1980_v5 = vmul.f32 %v3536_v3, %v1974_v4  ;;  %v3303_v6 = vpop.f32.mrb[37].mxu1 }
0x1180   : > { %v1977_v35 = vpop.f32.mrb[38].mxu1 }
0x1181   : > { %v1981_v7 = vpack.c.bf16 %v1980_v5, %v1980_v5  ;;  %v3304_v9 = vpop.f32.mrb[39].mxu1 }
0x1183   : > { %3308 = vmatmul.mubr.msk.bf16.vlgmr.msra.gmra.mrb[40].mxu0 %vm662_vm2, %v1981_v7 }
0x1184   : > { %3318 = vmatpush3.bf16.xpose.msra.mxu0 %v2088_v12  ;;  %3319 = vmatprep.mubr.msk.bf16.mxu0 %vm3615_vm1, %v3614_v26 }
0x1185   : > { %3329 = vmatprep.subr.bf16.mxu0 %v3614_v26 }
0x118b   : > { %3320 = vmatmul.mubr.msk.bf16.vlgmr.msra.gmra.mrb[44].mxu0 %vm662_vm2, %v2081_v13 }
0x118c   : > { %3331 = vmatprep.mubr.msk.bf16.mxu0 %vm3615_vm1, %v3614_v26  ;;  %3330 = vmatpush3.bf16.msra.mxu0 %v3473_v44  ;;  %v3488_v44 = vld [vmem:[%s4353_s10 + $0x80] sm:$0xff]  }
0x118d   : > { %3341 = vmatprep.subr.bf16.mxu0 %v3614_v26 }
0x124e   : > { %v2074_v14 = vpop.f32.mrb[40].mxu1 }
0x124f   : > { %v3315_v15 = vpop.f32.mrb[41].mxu1 }
0x1250   : > { %v2077_v16 = vpop.f32.mrb[42].mxu1 }
0x1251   : > { %v3316_v17 = vpop.f32.mrb[43].mxu1 }
0x1256   : > { %v2025_v18 = vpop.f32.mrb[40].mxu0 }
0x1257   : > { %v4131_v19 = vadd.f32 %v2074_v14, %v2025_v18  ;;  %v3309_v20 = vpop.f32.mrb[41].mxu0 }
0x1258   : > { %v2028_v22 = vpop.f32.mrb[42].mxu0 }
0x1259   : > { %v3310_v24 = vpop.f32.mrb[43].mxu0 }
0x125e   : > { %v2124_v25 = vpop.f32.mrb[44].mxu0 }
0x125f   : > { %v2125_v27 = vadd.f32 %v2124_v25, %v3834_v43  ;;  %v3321_v29 = vpop.f32.mrb[45].mxu0 }
0x1260   : > { %v2127_v30 = vpop.f32.mrb[46].mxu0 }
0x1261   : > { %v3322_v31 = vpop.f32.mrb[47].mxu0  ;;  %v2130_v32 = vsel %vm709_vm5, %v2125_v27, -inf }
0x1262   : > { %2131 = vmax.xlane.f32.xlu1 %v2130_v32 }
0x1273   : > { %2243 = vrot.lane.b32.xlu1 %v4062_v8, %s4388_s26  ;;  %v2242_v8 = vpop.permute.xlu0 %2241 }
0x12ef   : > { %v2132_v33 = vpop.xlane.xlu1 %2131 }
0x12f0   : > { %v2133_v34 = vsub.f32 %v2125_v27, %v2132_v33 }
0x12f2   : > { %v2134_v36 = vmul.f32 1.442695, %v2133_v34  ;;  %v3477_v34 = vld [vmem:[%s4351_s8 + $0x44] ss:$8 sps:$4 sm:$0xff]  }
0x12f3   : > { %v2244_v38 = vpop.permute.xlu1 %2243 }
0x12f4   : > { %3537 = vpow2.f32 %v2134_v36  ;;  %v2249_v42 = vsel %vm662_vm2, %v2244_v38, 0  ;;  %v3480_v36 = vld [vmem:[%s4351_s8 + $0x54] ss:$8 sps:$4 sm:$0xff]   ;;  %v3483_v38 = vld [vmem:[%s4351_s8 + $0x64] ss:$8 sps:$4 sm:$0xff]  }
0x12fe   : > { %v3538_v37 = vpop.eup %3537 }
0x12ff   : > { %v2136_v39 = vsel %vm709_vm5, %v3538_v37, 0.0  ;;  %v2140_v41 = vpack.c.bf16 %v3538_v37, %v3538_v37  ;;  %v3478_v37 = vld [vmem:[%s4351_s8 + $0x50] ss:$8 sps:$4 sm:$0xff]  }
0x1300   : > { %2137 = vadd.xlane.f32.xlu0 %v2136_v39  ;;  %v3481_v39 = vld [vmem:[%s4351_s8 + $0x60] ss:$8 sps:$4 sm:$0xff]  }
0x1301   : > { %3326 = vmatmul.mubr.msk.bf16.vlgmr.msra.gmra.mrb[44].mxu1 %vm709_vm5, %v2140_v41  ;;  %v3484_v41 = vld [vmem:[%s4351_s8 + $0x70] ss:$8 sps:$4 sm:$0xff]  }
0x1302   : > { %3336 = vmatpush3.bf16.xpose.msra.mxu1 %v2249_v42  ;;  %3337 = vmatprep.mubr.msk.bf16.mxu1 %vm3615_vm1, %v3614_v26  ;;  %v3486_v42 = vld [vmem:[%s4351_s8 + $0x74] ss:$8 sps:$4 sm:$0xff]  }
0x1303   : > { %3347 = vmatprep.subr.bf16.mxu1 %v3614_v26 }
0x1309   : > { %3338 = vmatmul.mubr.msk.bf16.vlgmr.msra.gmra.mrb[48].mxu1 %vm662_vm2, %v2242_v8  ;;  %v3487_v8 = vld [vmem:[%s4353_s10 + $0xc0] sm:$0xff]  }
0x130a   : > { %3349 = vmatprep.mubr.msk.bf16.mxu1 %vm3615_vm1, %v3614_v26 }
0x1316   : > { %2302 = vrot.lane.b32.xlu0 %v4064_v10, %s4387_s20  ;;  %s510_s20 = sand.u32 1, %s3603_s22  }
0x1317   : > { %s2923_s23 = sshll.u32 %s510_s20, 3  ;;  %s2847_s19 = scalar_lea.sflag [#allocation3], %s510_s20 }
0x1318   : > { %s512_s26 = scalar_lea.vmem [#allocation2], %s2923_s23  ;;  %s3624_s23 = smov [#allocation2]  }
0x1319   : > { %s2860_s28 = sshll.u32 %s512_s26, 4  ;;  %s3553_s30 = sshll.u32 %s3624_s23, 4  ;;  %s4303_s28 = int_to_ptr.vmem [resolvable:$true] %s2860_s28  ;;  %s3554_s30 = int_to_ptr.vmem [resolvable:$false] %s3553_s30 }
0x131a   : > { %s3549_s25 = scalar_lea.vmem %s4303_s28, 128  ;;  %s3555_s27 = scalar_lea.vmem %s3554_s30, 256 }
0x131b   : > { %p3550_p11 = scmp.ne.s32.totalorder %s4303_s28, %s3549_s25  ;;  %p3556_p0 = scmp.lt.s32.totalorder %s4303_s28, %s3554_s30 }
0x131c   : > { %p3557_p1 = scmp.lt.s32.totalorder %s3555_s27, %s3549_s25 }
0x131d   : > { %p3551_p12 = pnand %p3550_p11, %p3748_p5 }
0x131e   : > { %p3558_p2 = por %p3557_p1, %p3556_p0 }
0x131f   : > { %p3552_p13 = pneg %p3551_p12 }
0x1321   : > { %p3559_p3 = pnand %p3558_p2, %p3552_p13 }
0x138d   : > { %v2138_v46 = vpop.xlane.xlu0 %2137 }
0x138e   : > { %3539 = vrcp.f32 %v2138_v46  ;;  %v3489_v46 = vld [vmem:[%s4353_s10 + $0xc8] sm:$0xff]  }
0x1391   : > { %v2303_v52 = vpop.permute.xlu0 %2302 }
0x1392   : > { %v2308_v55 = vsel %vm724_vm3, %v2303_v52, 0  ;;  %v3494_v52 = vld [vmem:[%s4353_s10 + $0x98] sm:$0xff]  }
0x1398   : > { %v3540_v47 = vpop.eup %3539 }
0x13d4   : > { %v2183_v48 = vpop.f32.mrb[44].mxu1 }
0x13d5   : > { %v2189_v50 = vmul.f32 %v3540_v47, %v2183_v48  ;;  %v3327_v51 = vpop.f32.mrb[45].mxu1  ;;  %v3490_v47 = vld [vmem:[%s4353_s10 + $0x88] sm:$0xff]   ;;  %v3491_v48 = vld [vmem:[%s4353_s10 + $0xd0] sm:$0xff]  }
0x13d6   : > { %v2186_v0 = vpop.f32.mrb[46].mxu1  ;;  %v3493_v51 = vld [vmem:[%s4353_s10 + $0xd8] sm:$0xff]  }
0x13d7   : > { %v2190_v53 = vpack.c.bf16 %v2189_v50, %v2189_v50  ;;  %v3328_v54 = vpop.f32.mrb[47].mxu1  ;;  %v3492_v50 = vld [vmem:[%s4353_s10 + $0x90] sm:$0xff]   ;;  %v3495_v0 = vld [vmem:[%s4353_s10 + $0xe0] sm:$0xff]  }
0x13d8   : > { %v3497_v54 = vld [vmem:[%s4353_s10 + $0xe8] sm:$0xff]  }
0x13d9   : > { %3332 = vmatmul.mubr.msk.bf16.vlgmr.msra.gmra.mrb[48].mxu0 %vm662_vm2, %v2190_v53  ;;  %v3496_v53 = vld [vmem:[%s4353_s10 + $0xa0] sm:$0xff]  }
0x13da   : > { %3342 = vmatpush3.bf16.msra.mxu0 %v2308_v55  ;;  %3343 = vmatprep.mubr.msk.bf16.mxu0 %vm3615_vm1, %v3614_v26  ;;  %v3498_v55 = vld [vmem:[%s4353_s10 + $0xa8] sm:$0xff]  }
0x13db   : > { %2509 = vmatprep.subr.bf16.mxu0 %v3477_v34  ;;  %v3505_v34 = vld [vmem:[%s4357_s14 + $0x10] sm:$0xff]  }
0x13dc   : > { %v2285_v10 = vpop.f32.mrb[48].mxu1 }
0x13dd   : > { %v2286_v45 = vadd.f32 %v2285_v10, %v3834_v43  ;;  %v3339_v56 = vpop.f32.mrb[49].mxu1  ;;  %v3474_v43 = vld [vmem:[%s4347_s4 + $0x38] sm:$0xff]  }
0x13de   : > { %v2288_v57 = vpop.f32.mrb[50].mxu1  ;;  %3348 = vmatpush3.bf16.msra.mxu1 %v3474_v43  ;;  %v3501_v43 = vld [vmem:[%s4353_s10 + $0xf8] sm:$0xff]  }
0x13df   : > { %v3340_v58 = vpop.f32.mrb[51].mxu1  ;;  %v2291_v28 = vsel %vm709_vm5, %v2286_v45, -inf  ;;  %3182 = vmatprep.subr.bf16.mxu1 %v3487_v8  ;;  %v3101_v8 = vld [vmem:[%s4356_s13] ss:$0 sm:$0xff] }
0x13e0   : > { %2292 = vmax.xlane.f32.xlu1 %v2291_v28  ;;  %v3030_v58 = vld [vmem:[%s4349_s6 + $0x1] ss:$0 sm:$0xff] }
0x146d   : > { %v2293_v59 = vpop.xlane.xlu1 %2292 }
0x146e   : > { %v2294_v60 = vsub.f32 %v2286_v45, %v2293_v59  ;;  %v3031_v59 = vld [vmem:[%s4350_s7 + $0x1] ss:$0 sm:$0xff] }
0x1470   : > { %v2295_v61 = vmul.f32 1.442695, %v2294_v60 }
0x1472   : > { %3541 = vpow2.f32 %v2295_v61 }
0x147c   : > { %v3542_v62 = vpop.eup %3541 }
0x147d   : > { %v2297_v63 = vsel %vm709_vm5, %v3542_v62, 0.0  ;;  %v2301_v1 = vpack.c.bf16 %v3542_v62, %v3542_v62 }
0x147e   : > { %2298 = vadd.xlane.f32.xlu1 %v2297_v63  ;;  %v3499_v63 = vld [vmem:[%s4353_s10 + $0xf0] sm:$0xff]  }
0x147f   : > { %3344 = vmatmul.mubr.msk.bf16.vlgmr.msra.gmra.mrb[52].mxu0 %vm709_vm5, %v2301_v1  ;;  %v3500_v1 = vld [vmem:[%s4353_s10 + $0xb0] sm:$0xff]  }
0x1480   : > { %2541 = vmatprep.mubr.bf16.mxu0 %v3613_v11 }
0x14ac   : > { %v2234_v2 = vpop.f32.mrb[48].mxu0 }
0x14ad   : > { %v2240_v3 = vadd.f32 %v2234_v2, %v4131_v19  ;;  %v3333_v4 = vpop.f32.mrb[49].mxu0  ;;  %v3027_v19 = vld [vmem:[%s4348_s5 + $0x1] ss:$0 sm:$0xff]  ;;  %v3502_v2 = vld [vmem:[%s4353_s10 + $0xb8] sm:$0xff]  }
0x14ae   : > { %v2237_v5 = vpop.f32.mrb[50].mxu0 }
0x14af   : > { %v3334_v6 = vpop.f32.mrb[51].mxu0 }
0x150b   : > { %v2299_v35 = vpop.xlane.xlu1 %2298 }
0x150c   : > { %3543 = vrcp.f32 %v2299_v35 }
0x1516   : > { %v3544_v7 = vpop.eup %3543 }
0x1552   : > { %v2344_v9 = vpop.f32.mrb[52].mxu0 }
0x1553   : > { %v2350_v12 = vmul.f32 %v3544_v7, %v2344_v9  ;;  %v3345_v13 = vpop.f32.mrb[53].mxu0 }
0x1554   : > { %v2347_v14 = vpop.f32.mrb[54].mxu0 }
0x1555   : > { %v2351_v15 = vpack.c.bf16 %v2350_v12, %v2350_v12  ;;  %v3346_v11 = vpop.f32.mrb[55].mxu0 }
0x1557   : > { %3350 = vmatmul.mubr.msk.bf16.vlgmr.msra.gmra.mrb[52].mxu1 %vm662_vm2, %v2351_v15 }
0x1558   : > { %3183 = vmatpush3.bf16.msra.mxu1 %v3488_v44 }
0x1559   : > { %3184 = vmatprep.subr.bf16.mxu1 %v3489_v46 }
0x155c   : > { %3185 = vmatpush3.bf16.msra.mxu1 %v3490_v47 }
0x155d   : > { %3186 = vmatprep.subr.bf16.mxu1 %v3491_v48 }
0x1560   : > { %3187 = vmatpush3.bf16.msra.mxu1 %v3492_v50 }
0x1561   : > { %3188 = vmatprep.subr.bf16.mxu1 %v3493_v51 }
0x1564   : > { %3189 = vmatpush3.bf16.msra.mxu1 %v3494_v52 }
0x1565   : > { %3190 = vmatprep.subr.bf16.mxu1 %v3495_v0 }
0x1568   : > { %3191 = vmatpush3.bf16.msra.mxu1 %v3496_v53 }
0x1569   : > { %3192 = vmatprep.subr.bf16.mxu1 %v3497_v54 }
0x156c   : > { %3193 = vmatpush3.bf16.msra.mxu1 %v3498_v55 }
0x156d   : > { %3194 = vmatprep.subr.bf16.mxu1 %v3499_v63 }
0x1570   : > { %3195 = vmatpush3.bf16.msra.mxu1 %v3500_v1 }
0x1571   : > { %3196 = vmatprep.subr.bf16.mxu1 %v3501_v43 }
0x1574   : > { %3197 = vmatpush3.bf16.msra.mxu1 %v3502_v2 }
0x162a   : > { %v2395_v16 = vpop.f32.mrb[52].mxu1 }
0x162b   : > { %v2401_v17 = vadd.f32 %v2395_v16, %v2240_v3  ;;  %v3351_v18 = vpop.f32.mrb[53].mxu1  ;;  %v3040_v3 = vld [vmem:[%s4352_s9 + $0x2] sm:$0x3] }
0x162c   : > { %v2398_v20 = vpop.f32.mrb[54].mxu1  ;;  %v2459_v4 = vrot.slane %v3040_v3, %v1353_v21  ;;  %v2463_v5 = vrot.slane %v3040_v3, %v1357_v23 }
0x162d   : > { %v2402_v22 = vadd.f32 %v2401_v17, %v4022_v49  ;;  %v3352_v24 = vpop.f32.mrb[55].mxu1  ;;  %v3475_v49 = vld [vmem:[%s4351_s8 + $0x40] ss:$8 sps:$4 sm:$0xff]  }
0x162e   : > { %2510 = vmatpush1.bf16.msra.mxu0 %v3475_v49  ;;  %v3506_v49 = vld [vmem:[%s4357_s14 + $0x18] sm:$0xff]  }
0x162f   : > { %v4170_v25 = vadd.f32 %v3027_v19, %v2402_v22  ;;  %2511 = vmatprep.subr.bf16.mxu0 %v3480_v36 }
0x1631   : > { %v2416_v27 = vsel %vm527_vm0, %v4170_v25, 0.0 }
0x1632   : > { %2417 = vadd.xlane.f32.xlu1 %v2416_v27  ;;  %2512 = vmatpush1.bf16.msra.mxu0 %v3478_v37 }
0x1633   : > { %2513 = vmatprep.subr.bf16.mxu0 %v3483_v38 }
0x1636   : > { %2514 = vmatpush1.bf16.msra.mxu0 %v3481_v39 }
0x1637   : > { %2515 = vmatprep.subr.bf16.mxu0 %v3486_v42 }
0x163a   : > { %2516 = vmatpush1.bf16.msra.mxu0 %v3484_v41  ;;  %v3100_v41 = vld [vmem:[%s4355_s12] ss:$0 sm:$0xff] }
0x163b   : > { %3353 = vmatprep.subr.bf16.mxu0 %v3614_v26 }
0x16bf   : > { %v2418_v29 = vpop.xlane.xlu1 %2417 }
0x16c0   : > { %v2419_v30 = vmul.f32 0.015625, %v2418_v29 }
0x16c2   : > { %v2420_v31 = vsub.f32 %v4170_v25, %v2419_v30 }
0x16c4   : > { %v2421_v32 = vmul.f32 %v2420_v31, %v2420_v31 }
0x16c6   : > { %v2422_v33 = vsel %vm527_vm0, %v2421_v32, 0.0 }
0x16c7   : > { %2423 = vadd.xlane.f32.xlu0 %v2422_v33  ;;  %v3503_v33 = vld [vmem:[%s4357_s14] sm:$0xff]  }
0x1754   : > { %v2424_v10 = vpop.xlane.xlu0 %2423 }
0x1755   : > { %v2425_v45 = vmul.f32 0.015625, %v2424_v10 }
0x1757   : > { %v2426_v56 = vadd.f32 1e-05, %v2425_v45 }
0x1759   : > { %3545 = vrsqrt.f32 %v2426_v56 }
0x1763   : > { %v3546_v57 = vpop.eup %3545 }
0x1764   : > { %v2428_v28 = vmul.f32 %v3546_v57, %v2420_v31 }
0x1766   : > { %v2435_v60 = vmul.f32 %v3030_v58, %v2428_v28 }
0x1768   : > { %v2442_v61 = vadd.f32 %v3031_v59, %v2435_v60 }
0x176a   : > { %v2443_v62 = vpack.c.bf16 %v2442_v61, %v2442_v61 }
0x176c   : > { %3049 = vmatmul.mubr.msk.bf16.vlgmr.msra.gmra.mrb[56].mxu0 %vm527_vm0, %v2443_v62 }
0x176d   : > { %3361 = vmatprep.mubr.msk.bf16.mxu0 %vm3615_vm1, %v3614_v26  ;;  %3354 = vmatpush3.bf16.msra.mxu0 %v3503_v33 }
0x176e   : > { %3355 = vmatprep.subr.bf16.mxu0 %v3614_v26 }
0x183f   : > { %v2543_v6 = vpop.f32.mrb[56].mxu0 }
0x1840   : > { %v2544_v35 = vadd.f32 %v2543_v6, %v2459_v4  ;;  %v2545_v7 = vpop.f32.mrb[57].mxu0 }
0x1841   : > { %v2546_v9 = vadd.f32 %v2545_v7, %v2463_v5  ;;  %v2547_v12 = vpop.f32.mrb[58].mxu0 }
0x1842   : > { %v2550_v13 = vmax.f32 %v2544_v35, 0.0  ;;  %v2548_v14 = vpop.f32.mrb[59].mxu0 }
0x1843   : > { %v2551_v15 = vmax.f32 %v2546_v9, 0.0 }
0x1844   : > { %v2552_v16 = vpack.c.bf16 %v2550_v13, %v2550_v13 }
0x1845   : > { %v2553_v11 = vpack.c.bf16 %v2551_v15, %v2551_v15 }
0x1847   : > { %2715 = vmatprep.mubr.bf16.mxu1 %v2553_v11 }
0x1848   : > { %2716 = vmatmul.mubr.bf16.vlgmr.msra.gmra.mrb[56].mxu1 %v2552_v16 }
0x191b   : > { %v3198_v17 = vpop.f32.mrb[56].mxu1 }
0x191c   : > { %v3199_v18 = vpop.f32.mrb[57].mxu1 }
0x191d   : > { %v3200_v19 = vadd.f32 %v3199_v18, %v3198_v17  ;;  %v3201_v20 = vpop.f32.mrb[58].mxu1 }
0x191e   : > { %v3202_v21 = vpop.f32.mrb[59].mxu1 }
0x191f   : > { %v2723_v23 = vadd.f32 %v3200_v19, %v4170_v25  ;;  %v3504_v25 = vld [vmem:[%s4357_s14 + $0x8] sm:$0xff]  }
0x1920   : > { %3356 = vmatpush3.bf16.msra.mxu0 %v3504_v25 }
0x1921   : > { %v2732_v22 = vadd.f32 %v3099_v40, %v2723_v23  ;;  %3357 = vmatprep.subr.bf16.mxu0 %v3614_v26 }
0x1923   : > { %v2735_v24 = vsel %vm527_vm0, %v2732_v22, 0.0 }
0x1924   : > { %2736 = vadd.xlane.f32.xlu1 %v2735_v24  ;;  %3358 = vmatpush3.bf16.msra.mxu0 %v3505_v34 }
0x1925   : > { %3359 = vmatprep.subr.bf16.mxu0 %v3614_v26  ;;  %v3102_v26 = vld [vmem:[%s4358_s15] ss:$0 sm:$0xff] }
0x1928   : > { %3360 = vmatpush3.bf16.msra.mxu0 %v3506_v49 }
0x19b1   : > { %v2737_v27 = vpop.xlane.xlu1 %2736 }
0x19b2   : > { %v2738_v29 = vmul.f32 0.015625, %v2737_v27 }
0x19b4   : > { %v2739_v30 = vsub.f32 %v2732_v22, %v2738_v29 }
0x19b6   : > { %v2740_v31 = vmul.f32 %v2739_v30, %v2739_v30 }
0x19b8   : > { %v2741_v32 = vsel %vm527_vm0, %v2740_v31, 0.0 }
0x19b9   : > { %2742 = vadd.xlane.f32.xlu1 %v2741_v32 }
0x1a46   : > { %v2743_v36 = vpop.xlane.xlu1 %2742 }
0x1a47   : > { %v2744_v37 = vmul.f32 0.015625, %v2743_v36 }
0x1a49   : > { %v2745_v38 = vadd.f32 1e-05, %v2744_v37 }
0x1a4b   : > { %3547 = vrsqrt.f32 %v2745_v38 }
0x1a55   : > { %v3548_v39 = vpop.eup %3547 }
0x1a56   : > { %v2747_v42 = vmul.f32 %v3548_v39, %v2739_v30 }
0x1a58   : > { %v2754_v44 = vmul.f32 %v3100_v41, %v2747_v42 }
0x1a5a   : > { %v2761_v46 = vadd.f32 %v3101_v8, %v2754_v44 }
0x1a5c   : > { %v2762_v47 = vpack.c.bf16 %v2761_v46, %v2761_v46 }
0x1a5e   : > { %3362 = vmatmul.mubr.msk.bf16.vlgmr.msra.gmra.mrb[60].mxu0 %vm527_vm0, %v2762_v47 }
0x1b31   : > { %v2839_v48 = vpop.f32.mrb[60].mxu0 }
0x1b32   : > { %v2840_v50 = vadd.f32 %v3102_v26, %v2839_v48  ;;  %v3363_v51 = vpop.f32.mrb[61].mxu0 }
0x1b33   : > { %v2842_v52 = vpop.f32.mrb[62].mxu0 }
0x1b34   : > { %2845 = vst [vmem:[%s512_s26] sm:$0xff] %v2840_v50  ;;  %v3364_v0 = vpop.f32.mrb[63].mxu0 }
0x1b35   : > { %3562 = shalt.err (!%p3559_p3)
}
0x1b36   : > { %s3563_s20 = scalar_lea.hbm %s4301_s29, 128  ;;  %s3567_s17 = scalar_lea.hbm %s4359_s16, 256 }
0x1b37   : > { %p3564_p4 = scmp.ne.s32.totalorder %s4301_s29, %s3563_s20  ;;  %p3568_p9 = scmp.lt.u32.totalorder %s4301_s29, %s4359_s16 }
0x1b38   : > { %p3569_p10 = scmp.lt.u32.totalorder %s3567_s17, %s3563_s20  ;;  %p3571_p12 = scmp.lt.u32.totalorder %s3563_s20, %s4301_s29 }
0x1b39   : > { %p3565_p7 = pnand %p3564_p4, %p3748_p5 }
0x1b3a   : > { %p3570_p11 = por %p3569_p10, %p3568_p9 }
0x1b3b   : > { %p3566_p8 = pneg %p3565_p7 }
0x1b3c   : > { %p3572_p13 = por %p3571_p12, %p3570_p11 }
0x1b3e   : > { %p3573_p0 = pnand %p3572_p13, %p3566_p8 }
0x1b40   : > { %3576 = shalt.err (!%p3573_p0)
}
0x1b41   : > { %3365 = dma.vmem_to_hbm [thread:$0]  (%p3748_p5), %s4303_s28, 128, %s4301_s29, %s2847_s19  }
0x1b42 PF: > { %p3371_p1 = scmp.ge.s32.totalorder %s3611_s24, 2  ;;  %s2872_s27 = sand.u32 1, %s3599_s21  }
0x1b43   : > { %s2873_s18 = scalar_lea.sflag [#allocation3], %s2872_s27 }
0x1b44   : > { %p3368_p2 = pnand %p3371_p1, %p3752_p6 }
0x1b46   : > { %3594 = dma.done.wait (!%p3368_p2), %s2873_s18, 128  }
0x1b47   : > { %3596 = vsyncadd (!%p3368_p2), %s2873_s18, 4294967168  ;;  %s4390_s24 = sld [smem:[#allocation6_spill]]  ;;  %s4391_s20 = sld [smem:[#allocation5_spill]] }
0x1b48   : > { %s4392_s23 = sld [smem:[#allocation7_spill]]  ;;  %s4393_s21 = smov %s3603_s22 }
0x1b4d   : > { %p26_p3 = scmp.ge.s32.totalorder %s4390_s24, 4   ;;  %s4394_s22 = smov %s4391_s20 }
0x1b4f   :  { %28 = sbr.rel (!%p26_p3) target bundleno = 5 (0x5), region = 130 }
0x1b56   :  { %2878 = vsyncpa [#allocation3], 1 }
0x1b57   :  { %2880 = vsyncpa [#allocation3 + $0x1], 1 }

</bundles_post_ra>
